<compile_context>
chip_gen: v6e
topology: v6e:2x2x1
jax: 0.10.0
libtpu: 0.0.40
codegen_flags: <defaults>
</compile_context>

<pallas_src>
import functools

import jax
import jax.numpy as jnp
import numpy as np
from jax.experimental import pallas as pl
from jax.experimental.pallas import tpu as pltpu


# ----------------------------------------------------------------------------
# Kernel
# ----------------------------------------------------------------------------
def _layer_norm(x, gamma, beta, eps=1e-5):
    # x: (N, D). Matches nn.LayerNorm(D) (eps=1e-5).
    mu = jnp.mean(x, axis=-1, keepdims=True)
    var = jnp.mean((x - mu) ** 2, axis=-1, keepdims=True)
    return (x - mu) * jax.lax.rsqrt(var + eps) * gamma + beta


def encoder_kernel(num_layers, num_heads, batch, seq,
                   x_ref, mask_ref,
                   wq_ref, bq_ref, wk_ref, bk_ref, wv_ref, bv_ref, wo_ref, bo_ref,
                   ln1g_ref, ln1b_ref, ln2g_ref, ln2b_ref,
                   w1_ref, b1_ref, w2_ref, b2_ref,
                   lnfg_ref, lnfb_ref,
                   out_ref):
    B, S, H = batch, seq, num_heads
    x = x_ref[...]                                   # (B*S, D) — batch folded into M
    BS, D = x.shape
    dk = D // H
    dff = w1_ref.shape[-1]

    wq = wq_ref[...]; wk = wk_ref[...]; wv = wv_ref[...]; wo = wo_ref[...]
    w1 = w1_ref[...]; w2 = w2_ref[...]

    # ---- hoisted loop invariants (computed once, reused by every layer / head) ----
    # Additive mask (masked_fill(mask == 0, -1e9)), broadcast over heads, per batch.
    add_mask = jnp.where(mask_ref[...] == 0.0, jnp.float32(-1e9), jnp.float32(0.0))  # (B,S,S)
    add_mask_h = [jnp.broadcast_to(add_mask[b][None, :, :], (H, S, S)) for b in range(B)]

    # Pre-broadcast biases / LayerNorm affine params once (JAX does not CSE broadcast_in_dim,
    # so leaving the (1, D) adds inside the unrolled layer loop re-emits every broadcast).
    bq = jnp.broadcast_to(bq_ref[...], (BS, D))
    bk = jnp.broadcast_to(bk_ref[...], (BS, D))
    bv = jnp.broadcast_to(bv_ref[...], (BS, D))
    bo = jnp.broadcast_to(bo_ref[...], (BS, D))
    b1 = jnp.broadcast_to(b1_ref[...], (BS, dff))
    b2 = jnp.broadcast_to(b2_ref[...], (BS, D))
    ln1g = jnp.broadcast_to(ln1g_ref[...], (BS, D))
    ln1b = jnp.broadcast_to(ln1b_ref[...], (BS, D))
    ln2g = jnp.broadcast_to(ln2g_ref[...], (BS, D))
    ln2b = jnp.broadcast_to(ln2b_ref[...], (BS, D))

    # All encoder layers share one parameter set (the ModuleList re-uses the same layer).
    # num_layers is small -> static unroll.
    # TODO(synk): for large num_layers switch to lax.fori_loop to bound vreg live ranges.
    for _ in range(num_layers):
        # ---- multi-head self-attention sublayer (pre-norm residual) ----
        xn = _layer_norm(x, ln1g, ln1b)
        # QKV projections with the full (B*S) fed to the MXU as the M dimension.
        # (wq / bq were pre-scaled by 1/sqrt(dk) in the wrapper.)
        q = jnp.dot(xn, wq, preferred_element_type=jnp.float32) + bq
        k = jnp.dot(xn, wk, preferred_element_type=jnp.float32) + bk
        v = jnp.dot(xn, wv, preferred_element_type=jnp.float32) + bv

        attn_rows = []
        for b in range(B):                            # static; B is small
            qb = q[b * S:(b + 1) * S, :]              # (S, D) — aligned sublane slice
            kb = k[b * S:(b + 1) * S, :]
            vb = v[b * S:(b + 1) * S, :]
            # Head-major layouts via one 2-D transpose + tile-aligned leading-dim reshape
            # (no per-head dk-wide lane slicing, no per-head matmuls).
            qh_t = qb.T.reshape(H, dk, S)             # (H, dk, S)
            kh_t = kb.T.reshape(H, dk, S)             # (H, dk, S) — used directly as K^T
            vh_t = vb.T.reshape(H, dk, S)             # (H, dk, S) — used directly as V^T
            qh = jnp.transpose(qh_t, (0, 2, 1))       # (H, S, dk)

            # One batched contraction over all heads for the scores.
            s = jnp.einsum('hqd,hdk->hqk', qh, kh_t,
                           preferred_element_type=jnp.float32) + add_mask_h[b]
            s = s - jnp.max(s, axis=-1, keepdims=True)
            p = jnp.exp(s)
            p = p * pl.reciprocal(jnp.sum(p, axis=-1, keepdims=True), approx=True)
            # One batched contraction for the attention output, produced directly in the
            # transposed head-major layout so merging heads is a reshape + 2-D transpose
            # instead of a per-head concatenate.
            o_t = jnp.einsum('hek,hqk->heq', vh_t, p,
                             preferred_element_type=jnp.float32)   # (H, dk, S)
            attn_rows.append(o_t.reshape(D, S).T)                  # (S, D)

        o = jnp.concatenate(attn_rows, axis=0)                     # (B*S, D)
        x = x + jnp.dot(o, wo, preferred_element_type=jnp.float32) + bo

        # ---- position-wise feed-forward sublayer (pre-norm residual) ----
        xn2 = _layer_norm(x, ln2g, ln2b)
        h1 = jnp.maximum(jnp.dot(xn2, w1, preferred_element_type=jnp.float32) + b1, 0.0)
        x = x + jnp.dot(h1, w2, preferred_element_type=jnp.float32) + b2

    # Final nn.LayerNorm of the Encoder.
    out_ref[...] = _layer_norm(x, lnfg_ref[...], lnfb_ref[...])


# ----------------------------------------------------------------------------
# Wrapper
# ----------------------------------------------------------------------------
_PARAM_ORDER = ["wq", "bq", "wk", "bk", "wv", "bv", "wo", "bo",
                "ln1g", "ln1b", "ln2g", "ln2b",
                "w1", "b1", "w2", "b2",
                "lnfg", "lnfb"]


def encoder_forward(x, mask, params, *, num_layers, num_heads):
    B, S, D = x.shape
    dk = D // num_heads
    scale = 1.0 / float(np.sqrt(dk))

    # Wrapper-side plumbing (free XLA work, keeps the kernel lean):
    #  - fold the 1/sqrt(dk) attention scale into the Q projection weights/bias,
    #  - fold batch into the matmul M dimension by flattening x to (B*S, D).
    p = dict(params)
    p["wq"] = params["wq"] * scale
    p["bq"] = params["bq"] * scale
    x2 = x.reshape(B * S, D)

    kernel = functools.partial(encoder_kernel, num_layers, num_heads, B, S)

    def full_spec(arr):
        n = arr.ndim
        return pl.BlockSpec(arr.shape, lambda i, _n=n: (0,) * _n)

    weight_args = [p[k] for k in _PARAM_ORDER]
    weight_specs = [full_spec(a) for a in weight_args]

    out = pl.pallas_call(
        kernel,
        out_shape=jax.ShapeDtypeStruct((B * S, D), x.dtype),
        grid_spec=pltpu.PrefetchScalarGridSpec(
            num_scalar_prefetch=0,
            grid=(1,),
            in_specs=[pl.BlockSpec((B * S, D), lambda i: (0, 0)),
                      pl.BlockSpec((B, S, S), lambda i: (0, 0, 0))] + weight_specs,
            out_specs=pl.BlockSpec((B * S, D), lambda i: (0, 0)),
        ),
        # Single grid step (batch folded into M).  For large B one would instead grid over
        # B with dimension_semantics=("parallel",) to shard across v7x's two TensorCores.
        compiler_params=pltpu.CompilerParams(dimension_semantics=("arbitrary",)),
    )(x2, mask, *weight_args)
    return out.reshape(B, S, D)


# ----------------------------------------------------------------------------
# Pure-JAX reference (same math, used for a sanity check)
# ----------------------------------------------------------------------------
def encoder_reference(x, mask, params, *, num_layers, num_heads):
    B, S, D = x.shape
    dk = D // num_heads
    hi = jax.lax.Precision.HIGHEST

    def ln(x, g, b, eps=1e-5):
        mu = jnp.mean(x, axis=-1, keepdims=True)
        var = jnp.mean((x - mu) ** 2, axis=-1, keepdims=True)
        return (x - mu) / jnp.sqrt(var + eps) * g + b

    p = params
    for _ in range(num_layers):
        xn = ln(x, p["ln1g"], p["ln1b"])
        q = jnp.einsum("bsd,de->bse", xn, p["wq"], precision=hi) + p["bq"]
        k = jnp.einsum("bsd,de->bse", xn, p["wk"], precision=hi) + p["bk"]
        v = jnp.einsum("bsd,de->bse", xn, p["wv"], precision=hi) + p["bv"]
        q = q.reshape(B, S, num_heads, dk).transpose(0, 2, 1, 3)
        k = k.reshape(B, S, num_heads, dk).transpose(0, 2, 1, 3)
        v = v.reshape(B, S, num_heads, dk).transpose(0, 2, 1, 3)
        scores = jnp.einsum("bhqd,bhkd->bhqk", q, k, precision=hi) / np.sqrt(dk)
        scores = jnp.where(mask[:, None, :, :] == 0.0, -1e9, scores)
        pattn = jax.nn.softmax(scores, axis=-1)
        o = jnp.einsum("bhqk,bhkd->bhqd", pattn, v, precision=hi)
        o = o.transpose(0, 2, 1, 3).reshape(B, S, D)
        attn = jnp.einsum("bsd,de->bse", o, p["wo"], precision=hi) + p["bo"]
        x = x + attn
        xn2 = ln(x, p["ln2g"], p["ln2b"])
        h1 = jnp.maximum(jnp.einsum("bsd,df->bsf", xn2, p["w1"], precision=hi) + p["b1"], 0.0)
        ff = jnp.einsum("bsf,fd->bsd", h1, p["w2"], precision=hi) + p["b2"]
        x = x + ff
    return ln(x, p["lnfg"], p["lnfb"])


# ----------------------------------------------------------------------------
# Main
# ----------------------------------------------------------------------------
if __name__ == "__main__":
    B, S, D = 2, 8, 32
    NUM_HEADS = 4
    D_FF = 64
    NUM_LAYERS = 2

    key = jax.random.PRNGKey(0)
    keys = jax.random.split(key, 10)

    params = {
        "wq": jax.random.normal(keys[0], (D, D), jnp.float32) * 0.1,
        "bq": jnp.zeros((1, D), jnp.float32),
        "wk": jax.random.normal(keys[1], (D, D), jnp.float32) * 0.1,
        "bk": jnp.zeros((1, D), jnp.float32),
        "wv": jax.random.normal(keys[2], (D, D), jnp.float32) * 0.1,
        "bv": jnp.zeros((1, D), jnp.float32),
        "wo": jax.random.normal(keys[3], (D, D), jnp.float32) * 0.1,
        "bo": jnp.zeros((1, D), jnp.float32),
        "ln1g": jnp.ones((1, D), jnp.float32),
        "ln1b": jnp.zeros((1, D), jnp.float32),
        "ln2g": jnp.ones((1, D), jnp.float32),
        "ln2b": jnp.zeros((1, D), jnp.float32),
        "w1": jax.random.normal(keys[4], (D, D_FF), jnp.float32) * 0.1,
        "b1": jnp.zeros((1, D_FF), jnp.float32),
        "w2": jax.random.normal(keys[5], (D_FF, D), jnp.float32) * 0.1,
        "b2": jnp.zeros((1, D), jnp.float32),
        "lnfg": jnp.ones((1, D), jnp.float32),
        "lnfb": jnp.zeros((1, D), jnp.float32),
    }

    x = jax.random.normal(keys[6], (B, S, D), jnp.float32)

    # Padding-style mask: batch 0 attends to all 8 keys, batch 1 only to first 6.
    lengths = jnp.array([8, 6], dtype=jnp.int32)
    key_valid = (jnp.arange(S)[None, :] < lengths[:, None]).astype(jnp.float32)  # (B, S)
    mask = jnp.broadcast_to(key_valid[:, None, :], (B, S, S)).astype(jnp.float32)

    out = encoder_forward(x, mask, params, num_layers=NUM_LAYERS, num_heads=NUM_HEADS)
    out = jax.block_until_ready(out)

    ref = encoder_reference(x, mask, params, num_layers=NUM_LAYERS, num_heads=NUM_HEADS)
    np.testing.assert_allclose(np.asarray(out), np.asarray(ref), rtol=1e-2, atol=1e-2)

    print("KERNEL_OK")
</pallas_src>

<mosaic_0001>
module attributes {stable_mosaic.version = 11 : i64} {
  func.func @encoder_kernel(%arg0: i32, %arg1: memref<16x32xf32, #tpu.memory_space<vmem>>, %arg2: memref<2x8x8xf32, #tpu.memory_space<vmem>>, %arg3: memref<32x32xf32, #tpu.memory_space<vmem>>, %arg4: memref<1x32xf32, #tpu.memory_space<vmem>>, %arg5: memref<32x32xf32, #tpu.memory_space<vmem>>, %arg6: memref<1x32xf32, #tpu.memory_space<vmem>>, %arg7: memref<32x32xf32, #tpu.memory_space<vmem>>, %arg8: memref<1x32xf32, #tpu.memory_space<vmem>>, %arg9: memref<32x32xf32, #tpu.memory_space<vmem>>, %arg10: memref<1x32xf32, #tpu.memory_space<vmem>>, %arg11: memref<1x32xf32, #tpu.memory_space<vmem>>, %arg12: memref<1x32xf32, #tpu.memory_space<vmem>>, %arg13: memref<1x32xf32, #tpu.memory_space<vmem>>, %arg14: memref<1x32xf32, #tpu.memory_space<vmem>>, %arg15: memref<32x64xf32, #tpu.memory_space<vmem>>, %arg16: memref<1x64xf32, #tpu.memory_space<vmem>>, %arg17: memref<64x32xf32, #tpu.memory_space<vmem>>, %arg18: memref<1x32xf32, #tpu.memory_space<vmem>>, %arg19: memref<1x32xf32, #tpu.memory_space<vmem>>, %arg20: memref<1x32xf32, #tpu.memory_space<vmem>>, %arg21: memref<16x32xf32, #tpu.memory_space<vmem>>) attributes {dimension_semantics = [#tpu.dimension_semantics<arbitrary>], iteration_bounds = array<i64: 1>, scalar_prefetch = 0 : i64, scratch_operands = 0 : i64, tpu.core_type = #tpu.core_type<tc>, window_params = [{pipeline_mode = #tpu.pipeline_mode<synchronous>, transform_indices = @transform_0, window_bounds = array<i64: 16, 32>}, {pipeline_mode = #tpu.pipeline_mode<synchronous>, transform_indices = @transform_1, window_bounds = array<i64: 2, 8, 8>}, {pipeline_mode = #tpu.pipeline_mode<synchronous>, transform_indices = @transform_2, window_bounds = array<i64: 32, 32>}, {pipeline_mode = #tpu.pipeline_mode<synchronous>, transform_indices = @transform_3, window_bounds = array<i64: 1, 32>}, {pipeline_mode = #tpu.pipeline_mode<synchronous>, transform_indices = @transform_4, window_bounds = array<i64: 32, 32>}, {pipeline_mode = #tpu.pipeline_mode<synchronous>, transform_indices = @transform_5, window_bounds = array<i64: 1, 32>}, {pipeline_mode = #tpu.pipeline_mode<synchronous>, transform_indices = @transform_6, window_bounds = array<i64: 32, 32>}, {pipeline_mode = #tpu.pipeline_mode<synchronous>, transform_indices = @transform_7, window_bounds = array<i64: 1, 32>}, {pipeline_mode = #tpu.pipeline_mode<synchronous>, transform_indices = @transform_8, window_bounds = array<i64: 32, 32>}, {pipeline_mode = #tpu.pipeline_mode<synchronous>, transform_indices = @transform_9, window_bounds = array<i64: 1, 32>}, {pipeline_mode = #tpu.pipeline_mode<synchronous>, transform_indices = @transform_10, window_bounds = array<i64: 1, 32>}, {pipeline_mode = #tpu.pipeline_mode<synchronous>, transform_indices = @transform_11, window_bounds = array<i64: 1, 32>}, {pipeline_mode = #tpu.pipeline_mode<synchronous>, transform_indices = @transform_12, window_bounds = array<i64: 1, 32>}, {pipeline_mode = #tpu.pipeline_mode<synchronous>, transform_indices = @transform_13, window_bounds = array<i64: 1, 32>}, {pipeline_mode = #tpu.pipeline_mode<synchronous>, transform_indices = @transform_14, window_bounds = array<i64: 32, 64>}, {pipeline_mode = #tpu.pipeline_mode<synchronous>, transform_indices = @transform_15, window_bounds = array<i64: 1, 64>}, {pipeline_mode = #tpu.pipeline_mode<synchronous>, transform_indices = @transform_16, window_bounds = array<i64: 64, 32>}, {pipeline_mode = #tpu.pipeline_mode<synchronous>, transform_indices = @transform_17, window_bounds = array<i64: 1, 32>}, {pipeline_mode = #tpu.pipeline_mode<synchronous>, transform_indices = @transform_18, window_bounds = array<i64: 1, 32>}, {pipeline_mode = #tpu.pipeline_mode<synchronous>, transform_indices = @transform_19, window_bounds = array<i64: 1, 32>}, {pipeline_mode = #tpu.pipeline_mode<synchronous>, transform_indices = @transform_20, window_bounds = array<i64: 16, 32>}]} {
    %c0 = arith.constant 0 : index
    %c0_0 = arith.constant 0 : index
    %0 = vector.load %arg1[%c0, %c0_0] : memref<16x32xf32, #tpu.memory_space<vmem>>, vector<16x32xf32>
    %c0_1 = arith.constant 0 : index
    %c0_2 = arith.constant 0 : index
    %1 = vector.load %arg3[%c0_1, %c0_2] : memref<32x32xf32, #tpu.memory_space<vmem>>, vector<32x32xf32>
    %c0_3 = arith.constant 0 : index
    %c0_4 = arith.constant 0 : index
    %2 = vector.load %arg5[%c0_3, %c0_4] : memref<32x32xf32, #tpu.memory_space<vmem>>, vector<32x32xf32>
    %c0_5 = arith.constant 0 : index
    %c0_6 = arith.constant 0 : index
    %3 = vector.load %arg7[%c0_5, %c0_6] : memref<32x32xf32, #tpu.memory_space<vmem>>, vector<32x32xf32>
    %c0_7 = arith.constant 0 : index
    %c0_8 = arith.constant 0 : index
    %4 = vector.load %arg9[%c0_7, %c0_8] : memref<32x32xf32, #tpu.memory_space<vmem>>, vector<32x32xf32>
    %c0_9 = arith.constant 0 : index
    %c0_10 = arith.constant 0 : index
    %5 = vector.load %arg15[%c0_9, %c0_10] : memref<32x64xf32, #tpu.memory_space<vmem>>, vector<32x64xf32>
    %c0_11 = arith.constant 0 : index
    %c0_12 = arith.constant 0 : index
    %6 = vector.load %arg17[%c0_11, %c0_12] : memref<64x32xf32, #tpu.memory_space<vmem>>, vector<64x32xf32>
    %c0_13 = arith.constant 0 : index
    %c0_14 = arith.constant 0 : index
    %c0_15 = arith.constant 0 : index
    %7 = vector.load %arg2[%c0_13, %c0_14, %c0_15] : memref<2x8x8xf32, #tpu.memory_space<vmem>>, vector<2x8x8xf32>
    %cst = arith.constant 0.000000e+00 : f32
    %8 = vector.broadcast %cst : f32 to vector<2x8x8xf32>
    %9 = arith.cmpf oeq, %7, %8 : vector<2x8x8xf32>
    %cst_16 = arith.constant -1.000000e+09 : f32
    %cst_17 = arith.constant 0.000000e+00 : f32
    %10 = vector.broadcast %cst_16 : f32 to vector<2x8x8xf32>
    %11 = vector.broadcast %cst_17 : f32 to vector<2x8x8xf32>
    %12 = arith.select %9, %10, %11 : vector<2x8x8xi1>, vector<2x8x8xf32>
    %13 = vector.extract_strided_slice %12 {offsets = [0, 0, 0], sizes = [1, 8, 8], strides = [1, 1, 1]} : vector<2x8x8xf32> to vector<1x8x8xf32>
    %14 = vector.shape_cast %13 : vector<1x8x8xf32> to vector<8x8xf32>
    %15 = vector.shape_cast %14 : vector<8x8xf32> to vector<1x8x8xf32>
    %16 = vector.shape_cast %15 : vector<1x8x8xf32> to vector<1x8x8xf32>
    %17 = vector.broadcast %16 : vector<1x8x8xf32> to vector<4x8x8xf32>
    %18 = vector.extract_strided_slice %12 {offsets = [1, 0, 0], sizes = [1, 8, 8], strides = [1, 1, 1]} : vector<2x8x8xf32> to vector<1x8x8xf32>
    %19 = vector.shape_cast %18 : vector<1x8x8xf32> to vector<8x8xf32>
    %20 = vector.shape_cast %19 : vector<8x8xf32> to vector<1x8x8xf32>
    %21 = vector.shape_cast %20 : vector<1x8x8xf32> to vector<1x8x8xf32>
    %22 = vector.broadcast %21 : vector<1x8x8xf32> to vector<4x8x8xf32>
    %c0_18 = arith.constant 0 : index
    %c0_19 = arith.constant 0 : index
    %23 = vector.load %arg4[%c0_18, %c0_19] : memref<1x32xf32, #tpu.memory_space<vmem>>, vector<1x32xf32>
    %24 = vector.shape_cast %23 : vector<1x32xf32> to vector<1x32xf32>
    %25 = vector.broadcast %24 : vector<1x32xf32> to vector<16x32xf32>
    %c0_20 = arith.constant 0 : index
    %c0_21 = arith.constant 0 : index
    %26 = vector.load %arg6[%c0_20, %c0_21] : memref<1x32xf32, #tpu.memory_space<vmem>>, vector<1x32xf32>
    %27 = vector.shape_cast %26 : vector<1x32xf32> to vector<1x32xf32>
    %28 = vector.broadcast %27 : vector<1x32xf32> to vector<16x32xf32>
    %c0_22 = arith.constant 0 : index
    %c0_23 = arith.constant 0 : index
    %29 = vector.load %arg8[%c0_22, %c0_23] : memref<1x32xf32, #tpu.memory_space<vmem>>, vector<1x32xf32>
    %30 = vector.shape_cast %29 : vector<1x32xf32> to vector<1x32xf32>
    %31 = vector.broadcast %30 : vector<1x32xf32> to vector<16x32xf32>
    %c0_24 = arith.constant 0 : index
    %c0_25 = arith.constant 0 : index
    %32 = vector.load %arg10[%c0_24, %c0_25] : memref<1x32xf32, #tpu.memory_space<vmem>>, vector<1x32xf32>
    %33 = vector.shape_cast %32 : vector<1x32xf32> to vector<1x32xf32>
    %34 = vector.broadcast %33 : vector<1x32xf32> to vector<16x32xf32>
    %c0_26 = arith.constant 0 : index
    %c0_27 = arith.constant 0 : index
    %35 = vector.load %arg16[%c0_26, %c0_27] : memref<1x64xf32, #tpu.memory_space<vmem>>, vector<1x64xf32>
    %36 = vector.shape_cast %35 : vector<1x64xf32> to vector<1x64xf32>
    %37 = vector.broadcast %36 : vector<1x64xf32> to vector<16x64xf32>
    %c0_28 = arith.constant 0 : index
    %c0_29 = arith.constant 0 : index
    %38 = vector.load %arg18[%c0_28, %c0_29] : memref<1x32xf32, #tpu.memory_space<vmem>>, vector<1x32xf32>
    %39 = vector.shape_cast %38 : vector<1x32xf32> to vector<1x32xf32>
    %40 = vector.broadcast %39 : vector<1x32xf32> to vector<16x32xf32>
    %c0_30 = arith.constant 0 : index
    %c0_31 = arith.constant 0 : index
    %41 = vector.load %arg11[%c0_30, %c0_31] : memref<1x32xf32, #tpu.memory_space<vmem>>, vector<1x32xf32>
    %42 = vector.shape_cast %41 : vector<1x32xf32> to vector<1x32xf32>
    %43 = vector.broadcast %42 : vector<1x32xf32> to vector<16x32xf32>
    %c0_32 = arith.constant 0 : index
    %c0_33 = arith.constant 0 : index
    %44 = vector.load %arg12[%c0_32, %c0_33] : memref<1x32xf32, #tpu.memory_space<vmem>>, vector<1x32xf32>
    %45 = vector.shape_cast %44 : vector<1x32xf32> to vector<1x32xf32>
    %46 = vector.broadcast %45 : vector<1x32xf32> to vector<16x32xf32>
    %c0_34 = arith.constant 0 : index
    %c0_35 = arith.constant 0 : index
    %47 = vector.load %arg13[%c0_34, %c0_35] : memref<1x32xf32, #tpu.memory_space<vmem>>, vector<1x32xf32>
    %48 = vector.shape_cast %47 : vector<1x32xf32> to vector<1x32xf32>
    %49 = vector.broadcast %48 : vector<1x32xf32> to vector<16x32xf32>
    %c0_36 = arith.constant 0 : index
    %c0_37 = arith.constant 0 : index
    %50 = vector.load %arg14[%c0_36, %c0_37] : memref<1x32xf32, #tpu.memory_space<vmem>>, vector<1x32xf32>
    %51 = vector.shape_cast %50 : vector<1x32xf32> to vector<1x32xf32>
    %52 = vector.broadcast %51 : vector<1x32xf32> to vector<16x32xf32>
    %cst_38 = arith.constant dense<0.000000e+00> : vector<16xf32>
    %53 = vector.multi_reduction <add>, %0, %cst_38 [1] : vector<16x32xf32> to vector<16xf32>
    %54 = vector.shape_cast %53 : vector<16xf32> to vector<16x1xf32>
    %cst_39 = arith.constant 3.200000e+01 : f32
    %55 = vector.broadcast %cst_39 : f32 to vector<16x1xf32>
    %56 = arith.divf %54, %55 : vector<16x1xf32>
    %57 = vector.broadcast %56 : vector<16x1xf32> to vector<16x32xf32>
    %58 = arith.subf %0, %57 : vector<16x32xf32>
    %59 = arith.mulf %58, %58 : vector<16x32xf32>
    %cst_40 = arith.constant dense<0.000000e+00> : vector<16xf32>
    %60 = vector.multi_reduction <add>, %59, %cst_40 [1] : vector<16x32xf32> to vector<16xf32>
    %61 = vector.shape_cast %60 : vector<16xf32> to vector<16x1xf32>
    %cst_41 = arith.constant 3.200000e+01 : f32
    %62 = vector.broadcast %cst_41 : f32 to vector<16x1xf32>
    %63 = arith.divf %61, %62 : vector<16x1xf32>
    %64 = vector.broadcast %56 : vector<16x1xf32> to vector<16x32xf32>
    %65 = arith.subf %0, %64 : vector<16x32xf32>
    %cst_42 = arith.constant 9.99999974E-6 : f32
    %66 = vector.broadcast %cst_42 : f32 to vector<16x1xf32>
    %67 = arith.addf %63, %66 : vector<16x1xf32>
    %68 = math.rsqrt %67 : vector<16x1xf32>
    %69 = vector.broadcast %68 : vector<16x1xf32> to vector<16x32xf32>
    %70 = arith.mulf %65, %69 : vector<16x32xf32>
    %71 = arith.mulf %70, %43 : vector<16x32xf32>
    %72 = arith.addf %71, %46 : vector<16x32xf32>
    %cst_43 = arith.constant dense<0.000000e+00> : vector<16x32xf32>
    %73 = tpu.matmul %72, %1, %cst_43 {dimension_numbers = #tpu.dot_dimension_numbers<[1], [0], [0], [1], [0, 0, 1, 1], [], []>} : vector<16x32xf32>, vector<32x32xf32>, vector<16x32xf32> -> vector<16x32xf32>
    %74 = arith.addf %73, %25 : vector<16x32xf32>
    %cst_44 = arith.constant dense<0.000000e+00> : vector<16x32xf32>
    %75 = tpu.matmul %72, %2, %cst_44 {dimension_numbers = #tpu.dot_dimension_numbers<[1], [0], [0], [1], [0, 0, 1, 1], [], []>} : vector<16x32xf32>, vector<32x32xf32>, vector<16x32xf32> -> vector<16x32xf32>
    %76 = arith.addf %75, %28 : vector<16x32xf32>
    %cst_45 = arith.constant dense<0.000000e+00> : vector<16x32xf32>
    %77 = tpu.matmul %72, %3, %cst_45 {dimension_numbers = #tpu.dot_dimension_numbers<[1], [0], [0], [1], [0, 0, 1, 1], [], []>} : vector<16x32xf32>, vector<32x32xf32>, vector<16x32xf32> -> vector<16x32xf32>
    %78 = arith.addf %77, %31 : vector<16x32xf32>
    %79 = vector.extract_strided_slice %74 {offsets = [0, 0], sizes = [8, 32], strides = [1, 1]} : vector<16x32xf32> to vector<8x32xf32>
    %80 = vector.extract_strided_slice %76 {offsets = [0, 0], sizes = [8, 32], strides = [1, 1]} : vector<16x32xf32> to vector<8x32xf32>
    %81 = vector.extract_strided_slice %78 {offsets = [0, 0], sizes = [8, 32], strides = [1, 1]} : vector<16x32xf32> to vector<8x32xf32>
    %82 = tpu.transpose %79, [1, 0] : vector<8x32xf32> -> vector<32x8xf32>
    %83 = vector.shape_cast %82 : vector<32x8xf32> to vector<4x8x8xf32>
    %84 = tpu.transpose %80, [1, 0] : vector<8x32xf32> -> vector<32x8xf32>
    %85 = vector.shape_cast %84 : vector<32x8xf32> to vector<4x8x8xf32>
    %86 = tpu.transpose %81, [1, 0] : vector<8x32xf32> -> vector<32x8xf32>
    %87 = vector.shape_cast %86 : vector<32x8xf32> to vector<4x8x8xf32>
    %88 = tpu.transpose %83, [0, 2, 1] : vector<4x8x8xf32> -> vector<4x8x8xf32>
    "tpu.trace_start"() <{level = 10 : i32, message = "hqd,hdk->hqk"}> : () -> ()
    %cst_46 = arith.constant dense<0.000000e+00> : vector<4x8x8xf32>
    %89 = tpu.matmul %88, %85, %cst_46 {dimension_numbers = #tpu.dot_dimension_numbers<[2], [1], [1], [2], [0, 0, 0, 1, 1, 2], [0], [0]>} : vector<4x8x8xf32>, vector<4x8x8xf32>, vector<4x8x8xf32> -> vector<4x8x8xf32>
    "tpu.trace_stop"() : () -> ()
    %90 = arith.addf %89, %17 : vector<4x8x8xf32>
    %cst_47 = arith.constant dense<0xFF800000> : vector<4x8xf32>
    %91 = vector.multi_reduction <maximumf>, %90, %cst_47 [2] : vector<4x8x8xf32> to vector<4x8xf32>
    %92 = vector.shape_cast %91 : vector<4x8xf32> to vector<4x8x1xf32>
    %93 = vector.broadcast %92 : vector<4x8x1xf32> to vector<4x8x8xf32>
    %94 = arith.subf %90, %93 : vector<4x8x8xf32>
    %95 = math.exp %94 : vector<4x8x8xf32>
    %cst_48 = arith.constant dense<0.000000e+00> : vector<4x8xf32>
    %96 = vector.multi_reduction <add>, %95, %cst_48 [2] : vector<4x8x8xf32> to vector<4x8xf32>
    %97 = vector.shape_cast %96 : vector<4x8xf32> to vector<4x8x1xf32>
    %98 = tpu.reciprocal %97 {approx = true} : vector<4x8x1xf32> -> vector<4x8x1xf32>
    %99 = vector.broadcast %98 : vector<4x8x1xf32> to vector<4x8x8xf32>
    %100 = arith.mulf %95, %99 : vector<4x8x8xf32>
    "tpu.trace_start"() <{level = 10 : i32, message = "hek,hqk->heq"}> : () -> ()
    %cst_49 = arith.constant dense<0.000000e+00> : vector<4x8x8xf32>
    %101 = tpu.matmul %87, %100, %cst_49 {dimension_numbers = #tpu.dot_dimension_numbers<[2], [2], [1], [1], [0, 0, 0, 1, 1, 1], [0], [0]>} : vector<4x8x8xf32>, vector<4x8x8xf32>, vector<4x8x8xf32> -> vector<4x8x8xf32>
    "tpu.trace_stop"() : () -> ()
    %102 = vector.shape_cast %101 : vector<4x8x8xf32> to vector<32x8xf32>
    %103 = tpu.transpose %102, [1, 0] : vector<32x8xf32> -> vector<8x32xf32>
    %104 = vector.extract_strided_slice %74 {offsets = [8, 0], sizes = [8, 32], strides = [1, 1]} : vector<16x32xf32> to vector<8x32xf32>
    %105 = vector.extract_strided_slice %76 {offsets = [8, 0], sizes = [8, 32], strides = [1, 1]} : vector<16x32xf32> to vector<8x32xf32>
    %106 = vector.extract_strided_slice %78 {offsets = [8, 0], sizes = [8, 32], strides = [1, 1]} : vector<16x32xf32> to vector<8x32xf32>
    %107 = tpu.transpose %104, [1, 0] : vector<8x32xf32> -> vector<32x8xf32>
    %108 = vector.shape_cast %107 : vector<32x8xf32> to vector<4x8x8xf32>
    %109 = tpu.transpose %105, [1, 0] : vector<8x32xf32> -> vector<32x8xf32>
    %110 = vector.shape_cast %109 : vector<32x8xf32> to vector<4x8x8xf32>
    %111 = tpu.transpose %106, [1, 0] : vector<8x32xf32> -> vector<32x8xf32>
    %112 = vector.shape_cast %111 : vector<32x8xf32> to vector<4x8x8xf32>
    %113 = tpu.transpose %108, [0, 2, 1] : vector<4x8x8xf32> -> vector<4x8x8xf32>
    "tpu.trace_start"() <{level = 10 : i32, message = "hqd,hdk->hqk"}> : () -> ()
    %cst_50 = arith.constant dense<0.000000e+00> : vector<4x8x8xf32>
    %114 = tpu.matmul %113, %110, %cst_50 {dimension_numbers = #tpu.dot_dimension_numbers<[2], [1], [1], [2], [0, 0, 0, 1, 1, 2], [0], [0]>} : vector<4x8x8xf32>, vector<4x8x8xf32>, vector<4x8x8xf32> -> vector<4x8x8xf32>
    "tpu.trace_stop"() : () -> ()
    %115 = arith.addf %114, %22 : vector<4x8x8xf32>
    %cst_51 = arith.constant dense<0xFF800000> : vector<4x8xf32>
    %116 = vector.multi_reduction <maximumf>, %115, %cst_51 [2] : vector<4x8x8xf32> to vector<4x8xf32>
    %117 = vector.shape_cast %116 : vector<4x8xf32> to vector<4x8x1xf32>
    %118 = vector.broadcast %117 : vector<4x8x1xf32> to vector<4x8x8xf32>
    %119 = arith.subf %115, %118 : vector<4x8x8xf32>
    %120 = math.exp %119 : vector<4x8x8xf32>
    %cst_52 = arith.constant dense<0.000000e+00> : vector<4x8xf32>
    %121 = vector.multi_reduction <add>, %120, %cst_52 [2] : vector<4x8x8xf32> to vector<4x8xf32>
    %122 = vector.shape_cast %121 : vector<4x8xf32> to vector<4x8x1xf32>
    %123 = tpu.reciprocal %122 {approx = true} : vector<4x8x1xf32> -> vector<4x8x1xf32>
    %124 = vector.broadcast %123 : vector<4x8x1xf32> to vector<4x8x8xf32>
    %125 = arith.mulf %120, %124 : vector<4x8x8xf32>
    "tpu.trace_start"() <{level = 10 : i32, message = "hek,hqk->heq"}> : () -> ()
    %cst_53 = arith.constant dense<0.000000e+00> : vector<4x8x8xf32>
    %126 = tpu.matmul %112, %125, %cst_53 {dimension_numbers = #tpu.dot_dimension_numbers<[2], [2], [1], [1], [0, 0, 0, 1, 1, 1], [0], [0]>} : vector<4x8x8xf32>, vector<4x8x8xf32>, vector<4x8x8xf32> -> vector<4x8x8xf32>
    "tpu.trace_stop"() : () -> ()
    %127 = vector.shape_cast %126 : vector<4x8x8xf32> to vector<32x8xf32>
    %128 = tpu.transpose %127, [1, 0] : vector<32x8xf32> -> vector<8x32xf32>
    %129 = tpu.concatenate %103, %128 in 0 : vector<8x32xf32>, vector<8x32xf32> -> vector<16x32xf32>
    %cst_54 = arith.constant dense<0.000000e+00> : vector<16x32xf32>
    %130 = tpu.matmul %129, %4, %cst_54 {dimension_numbers = #tpu.dot_dimension_numbers<[1], [0], [0], [1], [0, 0, 1, 1], [], []>} : vector<16x32xf32>, vector<32x32xf32>, vector<16x32xf32> -> vector<16x32xf32>
    %131 = arith.addf %0, %130 : vector<16x32xf32>
    %132 = arith.addf %131, %34 : vector<16x32xf32>
    %cst_55 = arith.constant dense<0.000000e+00> : vector<16xf32>
    %133 = vector.multi_reduction <add>, %132, %cst_55 [1] : vector<16x32xf32> to vector<16xf32>
    %134 = vector.shape_cast %133 : vector<16xf32> to vector<16x1xf32>
    %cst_56 = arith.constant 3.200000e+01 : f32
    %135 = vector.broadcast %cst_56 : f32 to vector<16x1xf32>
    %136 = arith.divf %134, %135 : vector<16x1xf32>
    %137 = vector.broadcast %136 : vector<16x1xf32> to vector<16x32xf32>
    %138 = arith.subf %132, %137 : vector<16x32xf32>
    %139 = arith.mulf %138, %138 : vector<16x32xf32>
    %cst_57 = arith.constant dense<0.000000e+00> : vector<16xf32>
    %140 = vector.multi_reduction <add>, %139, %cst_57 [1] : vector<16x32xf32> to vector<16xf32>
    %141 = vector.shape_cast %140 : vector<16xf32> to vector<16x1xf32>
    %cst_58 = arith.constant 3.200000e+01 : f32
    %142 = vector.broadcast %cst_58 : f32 to vector<16x1xf32>
    %143 = arith.divf %141, %142 : vector<16x1xf32>
    %144 = vector.broadcast %136 : vector<16x1xf32> to vector<16x32xf32>
    %145 = arith.subf %132, %144 : vector<16x32xf32>
    %cst_59 = arith.constant 9.99999974E-6 : f32
    %146 = vector.broadcast %cst_59 : f32 to vector<16x1xf32>
    %147 = arith.addf %143, %146 : vector<16x1xf32>
    %148 = math.rsqrt %147 : vector<16x1xf32>
    %149 = vector.broadcast %148 : vector<16x1xf32> to vector<16x32xf32>
    %150 = arith.mulf %145, %149 : vector<16x32xf32>
    %151 = arith.mulf %150, %49 : vector<16x32xf32>
    %152 = arith.addf %151, %52 : vector<16x32xf32>
    %cst_60 = arith.constant dense<0.000000e+00> : vector<16x64xf32>
    %153 = tpu.matmul %152, %5, %cst_60 {dimension_numbers = #tpu.dot_dimension_numbers<[1], [0], [0], [1], [0, 0, 1, 1], [], []>} : vector<16x32xf32>, vector<32x64xf32>, vector<16x64xf32> -> vector<16x64xf32>
    %154 = arith.addf %153, %37 : vector<16x64xf32>
    %cst_61 = arith.constant 0.000000e+00 : f32
    %155 = vector.broadcast %cst_61 : f32 to vector<16x64xf32>
    %156 = arith.maximumf %154, %155 : vector<16x64xf32>
    %cst_62 = arith.constant dense<0.000000e+00> : vector<16x32xf32>
    %157 = tpu.matmul %156, %6, %cst_62 {dimension_numbers = #tpu.dot_dimension_numbers<[1], [0], [0], [1], [0, 0, 1, 1], [], []>} : vector<16x64xf32>, vector<64x32xf32>, vector<16x32xf32> -> vector<16x32xf32>
    %158 = arith.addf %132, %157 : vector<16x32xf32>
    %159 = arith.addf %158, %40 : vector<16x32xf32>
    %cst_63 = arith.constant dense<0.000000e+00> : vector<16xf32>
    %160 = vector.multi_reduction <add>, %159, %cst_63 [1] : vector<16x32xf32> to vector<16xf32>
    %161 = vector.shape_cast %160 : vector<16xf32> to vector<16x1xf32>
    %cst_64 = arith.constant 3.200000e+01 : f32
    %162 = vector.broadcast %cst_64 : f32 to vector<16x1xf32>
    %163 = arith.divf %161, %162 : vector<16x1xf32>
    %164 = vector.broadcast %163 : vector<16x1xf32> to vector<16x32xf32>
    %165 = arith.subf %159, %164 : vector<16x32xf32>
    %166 = arith.mulf %165, %165 : vector<16x32xf32>
    %cst_65 = arith.constant dense<0.000000e+00> : vector<16xf32>
    %167 = vector.multi_reduction <add>, %166, %cst_65 [1] : vector<16x32xf32> to vector<16xf32>
    %168 = vector.shape_cast %167 : vector<16xf32> to vector<16x1xf32>
    %cst_66 = arith.constant 3.200000e+01 : f32
    %169 = vector.broadcast %cst_66 : f32 to vector<16x1xf32>
    %170 = arith.divf %168, %169 : vector<16x1xf32>
    %171 = vector.broadcast %163 : vector<16x1xf32> to vector<16x32xf32>
    %172 = arith.subf %159, %171 : vector<16x32xf32>
    %cst_67 = arith.constant 9.99999974E-6 : f32
    %173 = vector.broadcast %cst_67 : f32 to vector<16x1xf32>
    %174 = arith.addf %170, %173 : vector<16x1xf32>
    %175 = math.rsqrt %174 : vector<16x1xf32>
    %176 = vector.broadcast %175 : vector<16x1xf32> to vector<16x32xf32>
    %177 = arith.mulf %172, %176 : vector<16x32xf32>
    %178 = arith.mulf %177, %43 : vector<16x32xf32>
    %179 = arith.addf %178, %46 : vector<16x32xf32>
    %cst_68 = arith.constant dense<0.000000e+00> : vector<16x32xf32>
    %180 = tpu.matmul %179, %1, %cst_68 {dimension_numbers = #tpu.dot_dimension_numbers<[1], [0], [0], [1], [0, 0, 1, 1], [], []>} : vector<16x32xf32>, vector<32x32xf32>, vector<16x32xf32> -> vector<16x32xf32>
    %181 = arith.addf %180, %25 : vector<16x32xf32>
    %cst_69 = arith.constant dense<0.000000e+00> : vector<16x32xf32>
    %182 = tpu.matmul %179, %2, %cst_69 {dimension_numbers = #tpu.dot_dimension_numbers<[1], [0], [0], [1], [0, 0, 1, 1], [], []>} : vector<16x32xf32>, vector<32x32xf32>, vector<16x32xf32> -> vector<16x32xf32>
    %183 = arith.addf %182, %28 : vector<16x32xf32>
    %cst_70 = arith.constant dense<0.000000e+00> : vector<16x32xf32>
    %184 = tpu.matmul %179, %3, %cst_70 {dimension_numbers = #tpu.dot_dimension_numbers<[1], [0], [0], [1], [0, 0, 1, 1], [], []>} : vector<16x32xf32>, vector<32x32xf32>, vector<16x32xf32> -> vector<16x32xf32>
    %185 = arith.addf %184, %31 : vector<16x32xf32>
    %186 = vector.extract_strided_slice %181 {offsets = [0, 0], sizes = [8, 32], strides = [1, 1]} : vector<16x32xf32> to vector<8x32xf32>
    %187 = vector.extract_strided_slice %183 {offsets = [0, 0], sizes = [8, 32], strides = [1, 1]} : vector<16x32xf32> to vector<8x32xf32>
    %188 = vector.extract_strided_slice %185 {offsets = [0, 0], sizes = [8, 32], strides = [1, 1]} : vector<16x32xf32> to vector<8x32xf32>
    %189 = tpu.transpose %186, [1, 0] : vector<8x32xf32> -> vector<32x8xf32>
    %190 = vector.shape_cast %189 : vector<32x8xf32> to vector<4x8x8xf32>
    %191 = tpu.transpose %187, [1, 0] : vector<8x32xf32> -> vector<32x8xf32>
    %192 = vector.shape_cast %191 : vector<32x8xf32> to vector<4x8x8xf32>
    %193 = tpu.transpose %188, [1, 0] : vector<8x32xf32> -> vector<32x8xf32>
    %194 = vector.shape_cast %193 : vector<32x8xf32> to vector<4x8x8xf32>
    %195 = tpu.transpose %190, [0, 2, 1] : vector<4x8x8xf32> -> vector<4x8x8xf32>
    "tpu.trace_start"() <{level = 10 : i32, message = "hqd,hdk->hqk"}> : () -> ()
    %cst_71 = arith.constant dense<0.000000e+00> : vector<4x8x8xf32>
    %196 = tpu.matmul %195, %192, %cst_71 {dimension_numbers = #tpu.dot_dimension_numbers<[2], [1], [1], [2], [0, 0, 0, 1, 1, 2], [0], [0]>} : vector<4x8x8xf32>, vector<4x8x8xf32>, vector<4x8x8xf32> -> vector<4x8x8xf32>
    "tpu.trace_stop"() : () -> ()
    %197 = arith.addf %196, %17 : vector<4x8x8xf32>
    %cst_72 = arith.constant dense<0xFF800000> : vector<4x8xf32>
    %198 = vector.multi_reduction <maximumf>, %197, %cst_72 [2] : vector<4x8x8xf32> to vector<4x8xf32>
    %199 = vector.shape_cast %198 : vector<4x8xf32> to vector<4x8x1xf32>
    %200 = vector.broadcast %199 : vector<4x8x1xf32> to vector<4x8x8xf32>
    %201 = arith.subf %197, %200 : vector<4x8x8xf32>
    %202 = math.exp %201 : vector<4x8x8xf32>
    %cst_73 = arith.constant dense<0.000000e+00> : vector<4x8xf32>
    %203 = vector.multi_reduction <add>, %202, %cst_73 [2] : vector<4x8x8xf32> to vector<4x8xf32>
    %204 = vector.shape_cast %203 : vector<4x8xf32> to vector<4x8x1xf32>
    %205 = tpu.reciprocal %204 {approx = true} : vector<4x8x1xf32> -> vector<4x8x1xf32>
    %206 = vector.broadcast %205 : vector<4x8x1xf32> to vector<4x8x8xf32>
    %207 = arith.mulf %202, %206 : vector<4x8x8xf32>
    "tpu.trace_start"() <{level = 10 : i32, message = "hek,hqk->heq"}> : () -> ()
    %cst_74 = arith.constant dense<0.000000e+00> : vector<4x8x8xf32>
    %208 = tpu.matmul %194, %207, %cst_74 {dimension_numbers = #tpu.dot_dimension_numbers<[2], [2], [1], [1], [0, 0, 0, 1, 1, 1], [0], [0]>} : vector<4x8x8xf32>, vector<4x8x8xf32>, vector<4x8x8xf32> -> vector<4x8x8xf32>
    "tpu.trace_stop"() : () -> ()
    %209 = vector.shape_cast %208 : vector<4x8x8xf32> to vector<32x8xf32>
    %210 = tpu.transpose %209, [1, 0] : vector<32x8xf32> -> vector<8x32xf32>
    %211 = vector.extract_strided_slice %181 {offsets = [8, 0], sizes = [8, 32], strides = [1, 1]} : vector<16x32xf32> to vector<8x32xf32>
    %212 = vector.extract_strided_slice %183 {offsets = [8, 0], sizes = [8, 32], strides = [1, 1]} : vector<16x32xf32> to vector<8x32xf32>
    %213 = vector.extract_strided_slice %185 {offsets = [8, 0], sizes = [8, 32], strides = [1, 1]} : vector<16x32xf32> to vector<8x32xf32>
    %214 = tpu.transpose %211, [1, 0] : vector<8x32xf32> -> vector<32x8xf32>
    %215 = vector.shape_cast %214 : vector<32x8xf32> to vector<4x8x8xf32>
    %216 = tpu.transpose %212, [1, 0] : vector<8x32xf32> -> vector<32x8xf32>
    %217 = vector.shape_cast %216 : vector<32x8xf32> to vector<4x8x8xf32>
    %218 = tpu.transpose %213, [1, 0] : vector<8x32xf32> -> vector<32x8xf32>
    %219 = vector.shape_cast %218 : vector<32x8xf32> to vector<4x8x8xf32>
    %220 = tpu.transpose %215, [0, 2, 1] : vector<4x8x8xf32> -> vector<4x8x8xf32>
    "tpu.trace_start"() <{level = 10 : i32, message = "hqd,hdk->hqk"}> : () -> ()
    %cst_75 = arith.constant dense<0.000000e+00> : vector<4x8x8xf32>
    %221 = tpu.matmul %220, %217, %cst_75 {dimension_numbers = #tpu.dot_dimension_numbers<[2], [1], [1], [2], [0, 0, 0, 1, 1, 2], [0], [0]>} : vector<4x8x8xf32>, vector<4x8x8xf32>, vector<4x8x8xf32> -> vector<4x8x8xf32>
    "tpu.trace_stop"() : () -> ()
    %222 = arith.addf %221, %22 : vector<4x8x8xf32>
    %cst_76 = arith.constant dense<0xFF800000> : vector<4x8xf32>
    %223 = vector.multi_reduction <maximumf>, %222, %cst_76 [2] : vector<4x8x8xf32> to vector<4x8xf32>
    %224 = vector.shape_cast %223 : vector<4x8xf32> to vector<4x8x1xf32>
    %225 = vector.broadcast %224 : vector<4x8x1xf32> to vector<4x8x8xf32>
    %226 = arith.subf %222, %225 : vector<4x8x8xf32>
    %227 = math.exp %226 : vector<4x8x8xf32>
    %cst_77 = arith.constant dense<0.000000e+00> : vector<4x8xf32>
    %228 = vector.multi_reduction <add>, %227, %cst_77 [2] : vector<4x8x8xf32> to vector<4x8xf32>
    %229 = vector.shape_cast %228 : vector<4x8xf32> to vector<4x8x1xf32>
    %230 = tpu.reciprocal %229 {approx = true} : vector<4x8x1xf32> -> vector<4x8x1xf32>
    %231 = vector.broadcast %230 : vector<4x8x1xf32> to vector<4x8x8xf32>
    %232 = arith.mulf %227, %231 : vector<4x8x8xf32>
    "tpu.trace_start"() <{level = 10 : i32, message = "hek,hqk->heq"}> : () -> ()
    %cst_78 = arith.constant dense<0.000000e+00> : vector<4x8x8xf32>
    %233 = tpu.matmul %219, %232, %cst_78 {dimension_numbers = #tpu.dot_dimension_numbers<[2], [2], [1], [1], [0, 0, 0, 1, 1, 1], [0], [0]>} : vector<4x8x8xf32>, vector<4x8x8xf32>, vector<4x8x8xf32> -> vector<4x8x8xf32>
    "tpu.trace_stop"() : () -> ()
    %234 = vector.shape_cast %233 : vector<4x8x8xf32> to vector<32x8xf32>
    %235 = tpu.transpose %234, [1, 0] : vector<32x8xf32> -> vector<8x32xf32>
    %236 = tpu.concatenate %210, %235 in 0 : vector<8x32xf32>, vector<8x32xf32> -> vector<16x32xf32>
    %cst_79 = arith.constant dense<0.000000e+00> : vector<16x32xf32>
    %237 = tpu.matmul %236, %4, %cst_79 {dimension_numbers = #tpu.dot_dimension_numbers<[1], [0], [0], [1], [0, 0, 1, 1], [], []>} : vector<16x32xf32>, vector<32x32xf32>, vector<16x32xf32> -> vector<16x32xf32>
    %238 = arith.addf %159, %237 : vector<16x32xf32>
    %239 = arith.addf %238, %34 : vector<16x32xf32>
    %cst_80 = arith.constant dense<0.000000e+00> : vector<16xf32>
    %240 = vector.multi_reduction <add>, %239, %cst_80 [1] : vector<16x32xf32> to vector<16xf32>
    %241 = vector.shape_cast %240 : vector<16xf32> to vector<16x1xf32>
    %cst_81 = arith.constant 3.200000e+01 : f32
    %242 = vector.broadcast %cst_81 : f32 to vector<16x1xf32>
    %243 = arith.divf %241, %242 : vector<16x1xf32>
    %244 = vector.broadcast %243 : vector<16x1xf32> to vector<16x32xf32>
    %245 = arith.subf %239, %244 : vector<16x32xf32>
    %246 = arith.mulf %245, %245 : vector<16x32xf32>
    %cst_82 = arith.constant dense<0.000000e+00> : vector<16xf32>
    %247 = vector.multi_reduction <add>, %246, %cst_82 [1] : vector<16x32xf32> to vector<16xf32>
    %248 = vector.shape_cast %247 : vector<16xf32> to vector<16x1xf32>
    %cst_83 = arith.constant 3.200000e+01 : f32
    %249 = vector.broadcast %cst_83 : f32 to vector<16x1xf32>
    %250 = arith.divf %248, %249 : vector<16x1xf32>
    %251 = vector.broadcast %243 : vector<16x1xf32> to vector<16x32xf32>
    %252 = arith.subf %239, %251 : vector<16x32xf32>
    %cst_84 = arith.constant 9.99999974E-6 : f32
    %253 = vector.broadcast %cst_84 : f32 to vector<16x1xf32>
    %254 = arith.addf %250, %253 : vector<16x1xf32>
    %255 = math.rsqrt %254 : vector<16x1xf32>
    %256 = vector.broadcast %255 : vector<16x1xf32> to vector<16x32xf32>
    %257 = arith.mulf %252, %256 : vector<16x32xf32>
    %258 = arith.mulf %257, %49 : vector<16x32xf32>
    %259 = arith.addf %258, %52 : vector<16x32xf32>
    %cst_85 = arith.constant dense<0.000000e+00> : vector<16x64xf32>
    %260 = tpu.matmul %259, %5, %cst_85 {dimension_numbers = #tpu.dot_dimension_numbers<[1], [0], [0], [1], [0, 0, 1, 1], [], []>} : vector<16x32xf32>, vector<32x64xf32>, vector<16x64xf32> -> vector<16x64xf32>
    %261 = arith.addf %260, %37 : vector<16x64xf32>
    %cst_86 = arith.constant 0.000000e+00 : f32
    %262 = vector.broadcast %cst_86 : f32 to vector<16x64xf32>
    %263 = arith.maximumf %261, %262 : vector<16x64xf32>
    %cst_87 = arith.constant dense<0.000000e+00> : vector<16x32xf32>
    %264 = tpu.matmul %263, %6, %cst_87 {dimension_numbers = #tpu.dot_dimension_numbers<[1], [0], [0], [1], [0, 0, 1, 1], [], []>} : vector<16x64xf32>, vector<64x32xf32>, vector<16x32xf32> -> vector<16x32xf32>
    %265 = arith.addf %239, %264 : vector<16x32xf32>
    %266 = arith.addf %265, %40 : vector<16x32xf32>
    %c0_88 = arith.constant 0 : index
    %c0_89 = arith.constant 0 : index
    %267 = vector.load %arg19[%c0_88, %c0_89] : memref<1x32xf32, #tpu.memory_space<vmem>>, vector<1x32xf32>
    %c0_90 = arith.constant 0 : index
    %c0_91 = arith.constant 0 : index
    %268 = vector.load %arg20[%c0_90, %c0_91] : memref<1x32xf32, #tpu.memory_space<vmem>>, vector<1x32xf32>
    %cst_92 = arith.constant dense<0.000000e+00> : vector<16xf32>
    %269 = vector.multi_reduction <add>, %266, %cst_92 [1] : vector<16x32xf32> to vector<16xf32>
    %270 = vector.shape_cast %269 : vector<16xf32> to vector<16x1xf32>
    %cst_93 = arith.constant 3.200000e+01 : f32
    %271 = vector.broadcast %cst_93 : f32 to vector<16x1xf32>
    %272 = arith.divf %270, %271 : vector<16x1xf32>
    %273 = vector.broadcast %272 : vector<16x1xf32> to vector<16x32xf32>
    %274 = arith.subf %266, %273 : vector<16x32xf32>
    %275 = arith.mulf %274, %274 : vector<16x32xf32>
    %cst_94 = arith.constant dense<0.000000e+00> : vector<16xf32>
    %276 = vector.multi_reduction <add>, %275, %cst_94 [1] : vector<16x32xf32> to vector<16xf32>
    %277 = vector.shape_cast %276 : vector<16xf32> to vector<16x1xf32>
    %cst_95 = arith.constant 3.200000e+01 : f32
    %278 = vector.broadcast %cst_95 : f32 to vector<16x1xf32>
    %279 = arith.divf %277, %278 : vector<16x1xf32>
    %280 = vector.broadcast %272 : vector<16x1xf32> to vector<16x32xf32>
    %281 = arith.subf %266, %280 : vector<16x32xf32>
    %cst_96 = arith.constant 9.99999974E-6 : f32
    %282 = vector.broadcast %cst_96 : f32 to vector<16x1xf32>
    %283 = arith.addf %279, %282 : vector<16x1xf32>
    %284 = math.rsqrt %283 : vector<16x1xf32>
    %285 = vector.broadcast %284 : vector<16x1xf32> to vector<16x32xf32>
    %286 = arith.mulf %281, %285 : vector<16x32xf32>
    %287 = vector.broadcast %267 : vector<1x32xf32> to vector<16x32xf32>
    %288 = arith.mulf %286, %287 : vector<16x32xf32>
    %289 = vector.broadcast %268 : vector<1x32xf32> to vector<16x32xf32>
    %290 = arith.addf %288, %289 : vector<16x32xf32>
    %c0_97 = arith.constant 0 : index
    %c0_98 = arith.constant 0 : index
    %291 = vector.load %arg21[%c0_97, %c0_98] : memref<16x32xf32, #tpu.memory_space<vmem>>, vector<16x32xf32>
    tpu.vector_store %arg21[%c0_97, %c0_98], %290 {strides = array<i32>} : memref<16x32xf32, #tpu.memory_space<vmem>>, vector<16x32xf32>,
    return
  }
  func.func @transform_0(%arg0: i32) -> (i32, i32) {
    %c0_i32 = arith.constant 0 : i32
    %c0_i32_0 = arith.constant 0 : i32
    %c0_i32_1 = arith.constant 0 : i32
    return %c0_i32, %c0_i32_0 : i32, i32
  }
  func.func @transform_1(%arg0: i32) -> (i32, i32, i32) {
    %c0_i32 = arith.constant 0 : i32
    %c0_i32_0 = arith.constant 0 : i32
    %c0_i32_1 = arith.constant 0 : i32
    %c0_i32_2 = arith.constant 0 : i32
    return %c0_i32, %c0_i32_0, %c0_i32_1 : i32, i32, i32
  }
  func.func @transform_2(%arg0: i32) -> (i32, i32) {
    %c0_i32 = arith.constant 0 : i32
    %c0_i32_0 = arith.constant 0 : i32
    %c0_i32_1 = arith.constant 0 : i32
    return %c0_i32, %c0_i32_0 : i32, i32
  }
  func.func @transform_3(%arg0: i32) -> (i32, i32) {
    %c0_i32 = arith.constant 0 : i32
    %c0_i32_0 = arith.constant 0 : i32
    %c0_i32_1 = arith.constant 0 : i32
    return %c0_i32, %c0_i32_0 : i32, i32
  }
  func.func @transform_4(%arg0: i32) -> (i32, i32) {
    %c0_i32 = arith.constant 0 : i32
    %c0_i32_0 = arith.constant 0 : i32
    %c0_i32_1 = arith.constant 0 : i32
    return %c0_i32, %c0_i32_0 : i32, i32
  }
  func.func @transform_5(%arg0: i32) -> (i32, i32) {
    %c0_i32 = arith.constant 0 : i32
    %c0_i32_0 = arith.constant 0 : i32
    %c0_i32_1 = arith.constant 0 : i32
    return %c0_i32, %c0_i32_0 : i32, i32
  }
  func.func @transform_6(%arg0: i32) -> (i32, i32) {
    %c0_i32 = arith.constant 0 : i32
    %c0_i32_0 = arith.constant 0 : i32
    %c0_i32_1 = arith.constant 0 : i32
    return %c0_i32, %c0_i32_0 : i32, i32
  }
  func.func @transform_7(%arg0: i32) -> (i32, i32) {
    %c0_i32 = arith.constant 0 : i32
    %c0_i32_0 = arith.constant 0 : i32
    %c0_i32_1 = arith.constant 0 : i32
    return %c0_i32, %c0_i32_0 : i32, i32
  }
  func.func @transform_8(%arg0: i32) -> (i32, i32) {
    %c0_i32 = arith.constant 0 : i32
    %c0_i32_0 = arith.constant 0 : i32
    %c0_i32_1 = arith.constant 0 : i32
    return %c0_i32, %c0_i32_0 : i32, i32
  }
  func.func @transform_9(%arg0: i32) -> (i32, i32) {
    %c0_i32 = arith.constant 0 : i32
    %c0_i32_0 = arith.constant 0 : i32
    %c0_i32_1 = arith.constant 0 : i32
    return %c0_i32, %c0_i32_0 : i32, i32
  }
  func.func @transform_10(%arg0: i32) -> (i32, i32) {
    %c0_i32 = arith.constant 0 : i32
    %c0_i32_0 = arith.constant 0 : i32
    %c0_i32_1 = arith.constant 0 : i32
    return %c0_i32, %c0_i32_0 : i32, i32
  }
  func.func @transform_11(%arg0: i32) -> (i32, i32) {
    %c0_i32 = arith.constant 0 : i32
    %c0_i32_0 = arith.constant 0 : i32
    %c0_i32_1 = arith.constant 0 : i32
    return %c0_i32, %c0_i32_0 : i32, i32
  }
  func.func @transform_12(%arg0: i32) -> (i32, i32) {
    %c0_i32 = arith.constant 0 : i32
    %c0_i32_0 = arith.constant 0 : i32
    %c0_i32_1 = arith.constant 0 : i32
    return %c0_i32, %c0_i32_0 : i32, i32
  }
  func.func @transform_13(%arg0: i32) -> (i32, i32) {
    %c0_i32 = arith.constant 0 : i32
    %c0_i32_0 = arith.constant 0 : i32
    %c0_i32_1 = arith.constant 0 : i32
    return %c0_i32, %c0_i32_0 : i32, i32
  }
  func.func @transform_14(%arg0: i32) -> (i32, i32) {
    %c0_i32 = arith.constant 0 : i32
    %c0_i32_0 = arith.constant 0 : i32
    %c0_i32_1 = arith.constant 0 : i32
    return %c0_i32, %c0_i32_0 : i32, i32
  }
  func.func @transform_15(%arg0: i32) -> (i32, i32) {
    %c0_i32 = arith.constant 0 : i32
    %c0_i32_0 = arith.constant 0 : i32
    %c0_i32_1 = arith.constant 0 : i32
    return %c0_i32, %c0_i32_0 : i32, i32
  }
  func.func @transform_16(%arg0: i32) -> (i32, i32) {
    %c0_i32 = arith.constant 0 : i32
    %c0_i32_0 = arith.constant 0 : i32
    %c0_i32_1 = arith.constant 0 : i32
    return %c0_i32, %c0_i32_0 : i32, i32
  }
  func.func @transform_17(%arg0: i32) -> (i32, i32) {
    %c0_i32 = arith.constant 0 : i32
    %c0_i32_0 = arith.constant 0 : i32
    %c0_i32_1 = arith.constant 0 : i32
    return %c0_i32, %c0_i32_0 : i32, i32
  }
  func.func @transform_18(%arg0: i32) -> (i32, i32) {
    %c0_i32 = arith.constant 0 : i32
    %c0_i32_0 = arith.constant 0 : i32
    %c0_i32_1 = arith.constant 0 : i32
    return %c0_i32, %c0_i32_0 : i32, i32
  }
  func.func @transform_19(%arg0: i32) -> (i32, i32) {
    %c0_i32 = arith.constant 0 : i32
    %c0_i32_0 = arith.constant 0 : i32
    %c0_i32_1 = arith.constant 0 : i32
    return %c0_i32, %c0_i32_0 : i32, i32
  }
  func.func @transform_20(%arg0: i32) -> (i32, i32) {
    %c0_i32 = arith.constant 0 : i32
    %c0_i32_0 = arith.constant 0 : i32
    %c0_i32_1 = arith.constant 0 : i32
    return %c0_i32, %c0_i32_0 : i32, i32
  }
}

</mosaic_0001>

<bundles_post_ra>
// kernel: tpu_custom_call.1
= control target key start
LH: loop header
LB: loop body
LE: loop exit
PB: predicated region body
PF: predicated region fallthrough
CT: control target
= control target key end

     0   :  { %s6474_s0 = inlined_call_operand.hbm [shape: f32[16,32], index: 0, kind: input, shape index: {}]   ;;  %s6475_s1 = inlined_call_operand.hbm [shape: f32[2,8,8], index: 1, kind: input, shape index: {}]   ;;  %s6476_s2 = inlined_call_operand.vmem [shape: f32[32,32], index: 2, kind: input, shape index: {}]   ;;  %s6477_s3 = inlined_call_operand.vmem [shape: f32[1,32], index: 3, kind: input, shape index: {}]   ;;  %s6478_s4 = inlined_call_operand.vmem [shape: f32[32,32], index: 4, kind: input, shape index: {}]   ;;  %s6479_s5 = inlined_call_operand.vmem [shape: f32[1,32], index: 5, kind: input, shape index: {}]   ;;  %s6480_s6 = inlined_call_operand.vmem [shape: f32[32,32], index: 6, kind: input, shape index: {}]   ;;  %s6481_s7 = inlined_call_operand.vmem [shape: f32[1,32], index: 7, kind: input, shape index: {}]   ;;  %s6482_s8 = inlined_call_operand.hbm [shape: f32[32,32], index: 8, kind: input, shape index: {}]   ;;  %s6483_s9 = inlined_call_operand.vmem [shape: f32[1,32], index: 9, kind: input, shape index: {}]   ;;  %s6484_s10 = inlined_call_operand.vmem [shape: f32[1,32], index: 10, kind: input, shape index: {}]   ;;  %s6485_s11 = inlined_call_operand.vmem [shape: f32[1,32], index: 11, kind: input, shape index: {}]   ;;  %s6486_s12 = inlined_call_operand.vmem [shape: f32[1,32], index: 12, kind: input, shape index: {}]   ;;  %s6487_s13 = inlined_call_operand.vmem [shape: f32[1,32], index: 13, kind: input, shape index: {}]   ;;  %s6488_s14 = inlined_call_operand.hbm [shape: f32[32,64], index: 14, kind: input, shape index: {}]   ;;  %s6489_s15 = inlined_call_operand.vmem [shape: f32[1,64], index: 15, kind: input, shape index: {}]   ;;  %s6490_s16 = inlined_call_operand.vmem [shape: f32[64,32], index: 16, kind: input, shape index: {}]   ;;  %s6491_s17 = inlined_call_operand.vmem [shape: f32[1,32], index: 17, kind: input, shape index: {}]   ;;  %s6492_s18 = inlined_call_operand.vmem [shape: f32[1,32], index: 18, kind: input, shape index: {}]   ;;  %s6493_s19 = inlined_call_operand.vmem [shape: f32[1,32], index: 19, kind: input, shape index: {}]   ;;  %s6494_s20 = inlined_call_operand.hbm [shape: f32[16,32], index: 20, kind: output, shape index: {}]  }
   0x1   :  { %6498 = sst [smem:[#allocation15_spill]] %s6474_s0 }
   0x2   :  { %6499 = sst [smem:[#allocation16_spill]] %s6475_s1 }
   0x3   :  { %6500 = sst [smem:[#allocation17_spill]] %s6476_s2 }
   0x4   :  { %6501 = sst [smem:[#allocation18_spill]] %s6477_s3 }
   0x5   :  { %6502 = sst [smem:[#allocation19_spill]] %s6478_s4 }
   0x6   :  { %25 = vsyncpa [#allocation3], 0 }
   0x7   :  { %26 = vsyncpa [#allocation6], 0 }
   0x8   :  { %27 = vsyncpa [#allocation9], 0 }
   0x9   :  { %28 = vsyncpa [#allocation4], 0  ;;  %s5708_s1 = smov [#allocation5]   ;;  %s5709_s23 = smov [#allocation2]  }
   0xa   :  { %s46_s22 = sshll.u32 %s5708_s1, 4  ;;  %s34_s24 = sshll.u32 %s5709_s23, 4  ;;  %s47_s22 = int_to_ptr.vmem [resolvable:$true] %s46_s22  ;;  %s35_s24 = int_to_ptr.vmem [resolvable:$true] %s34_s24 }
   0xb   :  { %s5608_s2 = scalar_lea.vmem %s47_s22, 256  ;;  %p5613_p1 = scmp.lt.s32.totalorder %s47_s22, %s47_s22 }
   0xc   :  { %p5609_p0 = scmp.ne.s32.totalorder %s47_s22, %s5608_s2  ;;  %p5614_p2 = scmp.lt.s32.totalorder %s5608_s2, %s5608_s2 }
   0xe   :  { %p5615_p3 = por %p5614_p2, %p5613_p1 }
  0x10   :  { %p5616_p4 = pnand %p5615_p3, %p5609_p0 }
  0x12   :  { %5619 = shalt.err (!%p5616_p4)
}
  0x13   :  { %s5710_s25 = smov 128   ;;  %s5711_s3 = smov 8  }
  0x14   :  { %s6503_s28 = sld [smem:[#allocation16_spill]]  ;;  %s5628_s4 = scalar_lea.vmem %s35_s24, 256 }
  0x15   :  { %p5629_p5 = scmp.ne.s32.totalorder %s35_s24, %s5628_s4  ;;  %p5633_p6 = scmp.lt.s32.totalorder %s35_s24, %s35_s24 }
  0x16   :  { %p5634_p7 = scmp.lt.s32.totalorder %s5628_s4, %s5628_s4 }
  0x18   :  { %p5635_p8 = por %p5634_p7, %p5633_p6 }
  0x1a   :  { %52 = dma.hbm_to_vmem [thread:$0]  %s6503_s28, 256, %s47_s22, [#allocation6], %s5710_s25, %s5710_s25, %s5711_s3  }
  0x1b   :  { %p5636_p9 = pnand %p5635_p8, %p5629_p5 }
  0x1d   :  { %5639 = shalt.err (!%p5636_p9)
}
  0x1e   :  { %s6504_s0 = sld [smem:[#allocation15_spill]]  ;;  %s5712_s21 = smov [#allocation7]  }
  0x1f   :  { %s70_s1 = sshll.u32 %s5712_s21, 4  ;;  %s5713_s23 = smov [#allocation8]   ;;  %s71_s1 = int_to_ptr.vmem [resolvable:$true] %s70_s1 }
  0x20   :  { %s92_s2 = sshll.u32 %s5713_s23, 4  ;;  %s5648_s22 = scalar_lea.vmem %s71_s1, 512  ;;  %s93_s2 = int_to_ptr.vmem [resolvable:$true] %s92_s2 }
  0x21   :  { %p5649_p10 = scmp.ne.s32.totalorder %s71_s1, %s5648_s22  ;;  %p5653_p11 = scmp.lt.s32.totalorder %s71_s1, %s71_s1 }
  0x22   :  { %p5654_p12 = scmp.lt.s32.totalorder %s5648_s22, %s5648_s22 }
  0x24   :  { %40 = dma.hbm_to_vmem [thread:$0]  %s6504_s0, 256, %s35_s24, [#allocation3], %s5710_s25, %s5710_s25, %s5711_s3  }
  0x25   :  { %p5655_p13 = por %p5654_p12, %p5653_p11 }
  0x27   :  { %p5656_p0 = pnand %p5655_p13, %p5649_p10 }
  0x29   :  { %5659 = shalt.err (!%p5656_p0)
}
  0x2a   :  { %76 = dma.hbm_to_vmem [thread:$0]  %s6482_s8, 512, %s71_s1, [#allocation6], %s5710_s25, %s5710_s25, %s5711_s3  }
  0x2b   :  { %s5668_s24 = scalar_lea.vmem %s93_s2, 512  ;;  %p5673_p2 = scmp.lt.s32.totalorder %s93_s2, %s93_s2 }
  0x2c   :  { %p5669_p1 = scmp.ne.s32.totalorder %s93_s2, %s5668_s24  ;;  %p5674_p3 = scmp.lt.s32.totalorder %s5668_s24, %s5668_s24 }
  0x2e   :  { %p5675_p4 = por %p5674_p3, %p5673_p2 }
  0x30   :  { %p5676_p5 = pnand %p5675_p4, %p5669_p1 }
  0x32   :  { %5679 = shalt.err (!%p5676_p5)
}
  0x33   :  { %98 = dma.hbm_to_vmem [thread:$0]  %s6488_s14, 512, %s93_s2, [#allocation9], %s5710_s25, %s5710_s25, %s5711_s3  }
  0x34   :  { %5700 = dma.done.wait [#allocation3], 256  }
  0x35   :  { %5701 = vsyncadd [#allocation3], 4294967040 }
  0x36   :  { %5702 = dma.done.wait [#allocation6], 768  }
  0x37   :  { %5703 = vsyncadd [#allocation6], 4294966528 }
  0x38   :  { %5704 = dma.done.wait [#allocation9], 512  }
  0x39   :  { %5705 = vsyncadd [#allocation9], 4294966784  ;;  %vm227_vm0 = vcmask 261120   ;;  %v5846_v0 = vld [vmem:[#allocation2] sm:$0xff]  ;;  %v5848_v1 = vld [vmem:[#allocation2 + $0x8] sm:$0xff]  ;;  %s6505_s29 = sld [smem:[#allocation17_spill]] }
  0x3a   :  { %v228_v2 = vsel %vm227_vm0, %v5846_v0, 0.0  ;;  %v231_v3 = vsel %vm227_vm0, %v5848_v1, 0.0  ;;  %v5866_v15 = vld [vmem:[%s6480_s6 + $0x18] sm:$0xff]  ;;  %v5878_v17 = vld [vmem:[%s6480_s6 + $0x10] sm:$0xff]  ;;  %v5896_v19 = vld [vmem:[%s6480_s6 + $0x8] sm:$0xff]  ;;  %s6506_s21 = sld [smem:[#allocation19_spill]] }
  0x3b   :  { %229 = vadd.xlane.f32.xlu0 %v228_v2  ;;  %5218 = vmatprep.subr.mxu0 %v5866_v15  ;;  %v5907_v21 = vld [vmem:[%s6480_s6] sm:$0xff]  ;;  %s6507_s4 = sld [smem:[#allocation18_spill]]  ;;  %v5714_v50 = vmov 0.0   ;;  %vm5715_vm1 = vmmov 0   ;;  %vm714_vm2 = vcmask 64512   ;;  %v151_v63 = vld [vmem:[#allocation5] sm:$0xff] }
  0x3c   :  { %5219 = vmatpush3.msra.mxu0 %v5866_v15  ;;  %v5923_v30 = vld [vmem:[%s6484_s10] ss:$0 sm:$0xff]  ;;  %vm153_vm3 = vcmp.eq.f32.partialorder %v151_v63, 0.0  ;;  %vm2481_vm5 = vcmask 523264   ;;  %s5716_s26 = smov [#allocation10]  }
  0x3d   :  { %5220 = vmatprep.subr.mxu0 %v5878_v17  ;;  %v5928_v32 = vld [vmem:[%s6485_s11] ss:$0 sm:$0xff]  ;;  %v6001_v2 = vsel %vm153_vm3, -1e+09, %v5714_v50  ;;  %s4954_s27 = sshll.u32 %s5716_s26, 4  ;;  %s4955_s27 = int_to_ptr.vmem [resolvable:$true] %s4954_s27 }
  0x3e   :  { %5221 = vmatpush3.msra.mxu0 %v5878_v17  ;;  %v5975_v47 = vld [vmem:[%s6479_s5] ss:$0 sm:$0xff]  ;;  %s5680_s24 = scalar_lea.vmem %s4955_s27, 256  ;;  %p5685_p7 = scmp.lt.s32.totalorder %s4955_s27, %s4955_s27 }
  0x3f   :  { %232 = vadd.xlane.f32.xlu0 %v231_v3  ;;  %v5861_v14 = vld [vmem:[%s6505_s29 + $0x18] sm:$0xff]  ;;  %v5871_v16 = vld [vmem:[%s6505_s29 + $0x10] sm:$0xff]  ;;  %v5885_v18 = vld [vmem:[%s6505_s29 + $0x8] sm:$0xff]  ;;  %5222 = vmatprep.subr.mxu0 %v5896_v19  ;;  %p5681_p6 = scmp.ne.s32.totalorder %s4955_s27, %s5680_s24  ;;  %p5686_p8 = scmp.lt.s32.totalorder %s5680_s24, %s5680_s24 }
  0x40   :  { %5196 = vmatprep.subr.mxu1 %v5861_v14  ;;  %v5902_v20 = vld [vmem:[%s6505_s29] sm:$0xff]  ;;  %v5912_v22 = vld [vmem:[%s6506_s21 + $0x18] sm:$0xff]  ;;  %5223 = vmatpush3.msra.mxu0 %v5896_v19  ;;  %v5939_v39 = vld [vmem:[%s6506_s21 + $0x10] sm:$0xff] }
  0x41   :  { %5197 = vmatpush3.msra.mxu1 %v5861_v14  ;;  %5224 = vmatprep.subr.mxu0 %v5907_v21  ;;  %v5948_v40 = vld [vmem:[%s6506_s21 + $0x8] sm:$0xff]  ;;  %v5955_v41 = vld [vmem:[%s6506_s21] sm:$0xff]  ;;  %p5687_p9 = por %p5686_p8, %p5685_p7 }
  0x42   :  { %5198 = vmatprep.subr.mxu1 %v5871_v16  ;;  %5225 = vmatpush3.msra.mxu0 %v5907_v21  ;;  %v5967_v43 = vld [vmem:[%s6507_s4] ss:$0 sm:$0xff] }
  0x43   :  { %5199 = vmatpush3.msra.mxu1 %v5871_v16  ;;  %5239 = vmatprep.subr.mxu0 %v5714_v50  ;;  %p5688_p10 = pnand %p5687_p9, %p5681_p6 }
  0x44   :  { %5200 = vmatprep.subr.mxu1 %v5885_v18 }
  0x45   :  { %5201 = vmatpush3.msra.mxu1 %v5885_v18 }
  0x46   :  { %5202 = vmatprep.subr.mxu1 %v5902_v20 }
  0x47   :  { %5203 = vmatpush3.msra.mxu1 %v5902_v20 }
  0x48   :  { %5207 = vmatprep.subr.mxu1 %v5912_v22 }
  0xc4   :  { %v230_v4 = vpop.xlane.xlu0 %229 }
  0xc5   :  { %v235_v5 = vmul.f32 0.03125, %v230_v4 }
  0xc7   :  { %v237_v6 = vsub.f32 %v5846_v0, %v235_v5 }
  0xc8   :  { %v233_v7 = vpop.xlane.xlu0 %232 }
  0xc9   :  { %v236_v8 = vmul.f32 0.03125, %v233_v7  ;;  %v239_v9 = vmul.f32 %v237_v6, %v237_v6 }
  0xcb   :  { %v238_v10 = vsub.f32 %v5848_v1, %v236_v8  ;;  %v241_v11 = vsel %vm227_vm0, %v239_v9, 0.0 }
  0xcc   :  { %242 = vadd.xlane.f32.xlu1 %v241_v11 }
  0xcd   :  { %v240_v12 = vmul.f32 %v238_v10, %v238_v10 }
  0xcf   :  { %v244_v13 = vsel %vm227_vm0, %v240_v12, 0.0 }
  0xd0   :  { %245 = vadd.xlane.f32.xlu1 %v244_v13 }
 0x155   :  { %v243_v23 = vpop.xlane.xlu1 %242 }
 0x156   :  { %v247_v24 = vmul.f32 0.03125, %v243_v23 }
 0x158   :  { %v249_v25 = vadd.f32 1e-05, %v247_v24 }
 0x159   :  { %v246_v26 = vpop.xlane.xlu1 %245 }
 0x15a   :  { %5513 = vrsqrt.f32 %v249_v25  ;;  %v248_v27 = vmul.f32 0.03125, %v246_v26 }
 0x15c   :  { %v250_v28 = vadd.f32 1e-05, %v248_v27 }
 0x15e   :  { %5515 = vrsqrt.f32 %v250_v28 }
 0x167   :  { %v5514_v29 = vpop.eup %5513 }
 0x168   :  { %v253_v31 = vmul.f32 %v5514_v29, %v237_v6 }
 0x16a   :  { %v255_v33 = vmul.f32 %v5923_v30, %v253_v31 }
 0x16b   :  { %v5516_v34 = vpop.eup %5515 }
 0x16c   :  { %v257_v35 = vadd.f32 %v5928_v32, %v255_v33  ;;  %v254_v36 = vmul.f32 %v5516_v34, %v238_v10 }
 0x16e   :  { %5204 = vmatprep.mubr.msk.f32.mxu1 %vm227_vm0, %v257_v35  ;;  %5226 = vmatprep.mubr.msk.f32.mxu0 %vm227_vm0, %v257_v35  ;;  %v256_v37 = vmul.f32 %v5923_v30, %v254_v36 }
 0x170   :  { %v258_v38 = vadd.f32 %v5928_v32, %v256_v37 }
 0x172   :  { %5205 = vmatmul.mubr.msk.f32.vlgmr.msra.gmra.mxu1 %vm227_vm0, %v258_v38  ;;  %5227 = vmatmul.mubr.msk.f32.vlgmr.msra.gmra.mxu0 %vm227_vm0, %v258_v38 }
 0x173   :  { %5208 = vmatpush3.msra.mxu1 %v5912_v22  ;;  %5215 = vmatprep.mubr.msk.f32.mxu1 %vm227_vm0, %v257_v35 }
 0x174   :  { %5209 = vmatprep.subr.mxu1 %v5939_v39  ;;  %5241 = vmatprep.mubr.msk.f32.mxu0 %vm5715_vm1, %v5714_v50 }
 0x175   :  { %5210 = vmatpush3.msra.mxu1 %v5939_v39 }
 0x176   :  { %5211 = vmatprep.subr.mxu1 %v5948_v40 }
 0x177   :  { %5212 = vmatpush3.msra.mxu1 %v5948_v40 }
 0x178   :  { %5213 = vmatprep.subr.mxu1 %v5955_v41 }
 0x179   :  { %5214 = vmatpush3.msra.mxu1 %v5955_v41 }
 0x17a   :  { %5216 = vmatmul.mubr.msk.f32.vlgmr.msra.gmra.mxu1 %vm227_vm0, %v258_v38  ;;  %5229 = vmatprep.subr.mxu1 %v5714_v50 }
 0x17b   :  { %5231 = vmatprep.mubr.msk.f32.mxu1 %vm5715_vm1, %v5714_v50 }
 0x232   :  { %v5962_v42 = vpop.f32.mrf.mxu1  ;;  %v6004_v5 = vpop.f32.mrf.mxu0 }
 0x234   :  { %v331_v44 = vpop.f32.mrf.mxu1  ;;  %v481_v10 = vpop.f32.mrf.mxu0 }
 0x235   :  { %v332_v45 = vadd.f32 %v5967_v43, %v331_v44 }
 0x237   :  { %490 = vxpose.xlu0.b32.start.end [1/1] (short) (narrow) %v332_v45, 32 }
 0x23a   :  { %v5970_v46 = vpop.f32.mrf.mxu1 }
 0x23b   :  { %v412_v63 = vadd.f32 %v5970_v46, %v5975_v47 }
 0x23c   :  { %v406_v48 = vpop.f32.mrf.mxu1 }
 0x23d   :  { %v407_v49 = vadd.f32 %v5975_v47, %v406_v48 }
 0x23f   :  { %522 = vxpose.xlu1.b32.start.end [1/1] (short) (narrow) %v407_v49, 32 }
 0x2b3   :  { %v506_v51 = vpop.trf.xlu0 }
 0x2b4   :  { %586 = vxpose.xlu0.b32.start.end [1/1] (short) (narrow) %v506_v51, 8 }
 0x2b7   :  { %v507_v52 = vpop.trf.xlu0 }
 0x2b8   :  { %618 = vxpose.xlu1.b32.start.end [1/1] (short) (narrow) %v507_v52, 8 }
 0x2bb   :  { %v508_v53 = vpop.trf.xlu0  ;;  %v538_v54 = vpop.trf.xlu1 }
 0x2bc   :  { %650 = vxpose.xlu0.b32.start.end [1/1] (short) (narrow) %v508_v53, 8  ;;  %5230 = vmatpush3.msra.mxu1 %v538_v54 }
 0x2bd   :  { %5234 = vmatprep.subr.mxu1 %v5714_v50 }
 0x2bf   :  { %v509_v55 = vpop.trf.xlu0  ;;  %v539_v56 = vpop.trf.xlu1 }
 0x2c0   :  { %682 = vxpose.xlu0.b32.start.end [1/1] (short) (narrow) %v509_v55, 8 }
 0x2c3   :  { %v540_v57 = vpop.trf.xlu1 }
 0x2c4   :  { %5240 = vmatpush3.msra.mxu0 %v540_v57 }
 0x2c5   :  { %5249 = vmatprep.subr.mxu0 %v5714_v50 }
 0x2c7   :  { %v541_v58 = vpop.trf.xlu1 }
 0x330   :  { %v602_v59 = vpop.trf.xlu0 }
 0x331   :  { %5232 = vmatmul.mubr.msk.f32.vlgmr.msra.gmra.mxu1 %vm714_vm2, %v602_v59 }
 0x332   :  { %5235 = vmatpush3.msra.mxu1 %v539_v56  ;;  %5236 = vmatprep.mubr.msk.f32.mxu1 %vm5715_vm1, %v5714_v50 }
 0x333   :  { %5244 = vmatprep.subr.mxu1 %v5714_v50 }
 0x334   :  { %v634_v60 = vpop.trf.xlu1 }
 0x335   :  { %5237 = vmatmul.mubr.msk.f32.vlgmr.msra.gmra.mxu1 %vm714_vm2, %v634_v60  ;;  %v337_v60 = vadd.f32 %v5962_v42, %v5967_v43 }
 0x336   :  { %5245 = vmatpush3.msra.mxu1 %v541_v58  ;;  %5246 = vmatprep.mubr.msk.f32.mxu1 %vm5715_vm1, %v5714_v50 }
 0x337   :  { %5254 = vmatprep.subr.mxu1 %v5714_v50 }
 0x338   :  { %v666_v61 = vpop.trf.xlu0 }
 0x339   :  { %5242 = vmatmul.mubr.msk.f32.vlgmr.msra.gmra.mxu0 %vm714_vm2, %v666_v61  ;;  %v6022_v61 = vld [vmem:[%s6481_s7] ss:$0 sm:$0xff] }
 0x33a   :  { %5251 = vmatprep.mubr.msk.f32.mxu0 %vm5715_vm1, %v5714_v50 }
 0x33c   :  { %v698_v62 = vpop.trf.xlu0 }
 0x33d   :  { %5247 = vmatmul.mubr.msk.f32.vlgmr.msra.gmra.mxu1 %vm714_vm2, %v698_v62  ;;  %v482_v62 = vadd.f32 %v6022_v61, %v481_v10 }
 0x33e   :  { %5256 = vmatprep.mubr.msk.f32.mxu1 %vm5715_vm1, %v5714_v50 }
 0x3f1   :  { %v784_v3 = vpop.f32.mrf.mxu1 }
 0x3f2   :  { %v785_v4 = vadd.f32 %v784_v3, %v6001_v2 }
 0x3f3   :  { %v5233_v6 = vpop.f32.mrf.mxu1 }
 0x3f4   :  { %v1007_v7 = vsel %vm714_vm2, %v785_v4, -inf }
 0x3f5   :  { %1008 = vmax.xlane.f32.xlu1 %v1007_v7  ;;  %v857_v8 = vpop.f32.mrf.mxu1 }
 0x3f6   :  { %v858_v9 = vadd.f32 %v857_v8, %v6001_v2 }
 0x3f7   :  { %v5238_v11 = vpop.f32.mrf.mxu1 }
 0x3f8   :  { %v1010_v12 = vsel %vm714_vm2, %v858_v9, -inf }
 0x3f9   :  { %1011 = vmax.xlane.f32.xlu0 %v1010_v12  ;;  %v930_v13 = vpop.f32.mrf.mxu0 }
 0x3fa   :  { %v931_v23 = vadd.f32 %v930_v13, %v6001_v2 }
 0x3fb   :  { %v5243_v24 = vpop.f32.mrf.mxu0 }
 0x3fc   :  { %v1013_v25 = vsel %vm714_vm2, %v931_v23, -inf }
 0x3fd   :  { %1014 = vmax.xlane.f32.xlu1 %v1013_v25  ;;  %v1003_v26 = vpop.f32.mrf.mxu1 }
 0x3fe   :  { %v1004_v27 = vadd.f32 %v1003_v26, %v6001_v2 }
 0x3ff   :  { %v5248_v28 = vpop.f32.mrf.mxu1 }
 0x400   :  { %v1016_v29 = vsel %vm714_vm2, %v1004_v27, -inf }
 0x401   :  { %1017 = vmax.xlane.f32.xlu1 %v1016_v29 }
 0x47e   :  { %v1009_v31 = vpop.xlane.xlu1 %1008 }
 0x47f   :  { %v1019_v33 = vsub.f32 %v785_v4, %v1009_v31 }
 0x481   :  { %v1023_v34 = vmul.f32 1.442695, %v1019_v33 }
 0x482   :  { %v1012_v35 = vpop.xlane.xlu0 %1011 }
 0x483   :  { %5517 = vpow2.f32 %v1023_v34  ;;  %v1020_v36 = vsub.f32 %v858_v9, %v1012_v35 }
 0x485   :  { %v1025_v37 = vmul.f32 1.442695, %v1020_v36 }
 0x486   :  { %v1015_v38 = vpop.xlane.xlu1 %1014 }
 0x487   :  { %5519 = vpow2.f32 %v1025_v37  ;;  %v1021_v44 = vsub.f32 %v931_v23, %v1015_v38 }
 0x489   :  { %v1027_v45 = vmul.f32 1.442695, %v1021_v44 }
 0x48a   :  { %v1018_v48 = vpop.xlane.xlu1 %1017 }
 0x48b   :  { %5521 = vpow2.f32 %v1027_v45  ;;  %v1022_v49 = vsub.f32 %v1004_v27, %v1018_v48 }
 0x48d   :  { %v1029_v51 = vmul.f32 1.442695, %v1022_v49 }
 0x48f   :  { %5523 = vpow2.f32 %v1029_v51 }
 0x490   :  { %v5518_v52 = vpop.eup %5517 }
 0x491   :  { %v1031_v53 = vsel %vm714_vm2, %v5518_v52, 0.0 }
 0x492   :  { %1032 = vadd.xlane.f32.xlu0 %v1031_v53 }
 0x494   :  { %v5520_v54 = vpop.eup %5519 }
 0x495   :  { %v1034_v55 = vsel %vm714_vm2, %v5520_v54, 0.0 }
 0x496   :  { %1035 = vadd.xlane.f32.xlu1 %v1034_v55 }
 0x498   :  { %v5522_v56 = vpop.eup %5521 }
 0x499   :  { %v1037_v57 = vsel %vm714_vm2, %v5522_v56, 0.0 }
 0x49a   :  { %1038 = vadd.xlane.f32.xlu0 %v1037_v57  ;;  %v152_v57 = vld [vmem:[#allocation5 + $0x8] sm:$0xff] }
 0x49b   :  { %vm154_vm4 = vcmp.eq.f32.partialorder %v152_v57, 0.0  ;;  %v487_v57 = vadd.f32 %v6004_v5, %v6022_v61 }
 0x49c   :  { %v5524_v58 = vpop.eup %5523 }
 0x49d   :  { %v1040_v59 = vsel %vm714_vm2, %v5524_v58, 0.0 }
 0x49e   :  { %1041 = vadd.xlane.f32.xlu1 %v1040_v59 }
 0x4c7   :  { %1387 = vxpose.xlu0.b32.start.end [1/1] (short) (narrow) %v337_v60, 32 }
 0x4d1   :  { %554 = vxpose.xlu1.b32.start.end [1/1] (short) (narrow) %v482_v62, 32 }
 0x4d4   :  { %1419 = vxpose.xlu0.b32.start.end [1/1] (short) (narrow) %v412_v63, 32 }
 0x51b   :  { %v1033_v3 = vpop.xlane.xlu0 %1032 }
 0x51c   :  { %5525 = vrcp.f32 %v1033_v3 }
 0x51f   :  { %v1036_v4 = vpop.xlane.xlu1 %1035 }
 0x520   :  { %5527 = vrcp.f32 %v1036_v4 }
 0x523   :  { %v1039_v9 = vpop.xlane.xlu0 %1038 }
 0x524   :  { %5529 = vrcp.f32 %v1039_v9 }
 0x527   :  { %v1042_v46 = vpop.xlane.xlu1 %1041 }
 0x528   :  { %5531 = vrcp.f32 %v1042_v46 }
 0x529   :  { %v5526_v6 = vpop.eup %5525 }
 0x52a   :  { %v1047_v7 = vmul.f32 %v5526_v6, %v5518_v52 }
 0x52c   :  { %5250 = vmatpush3.xpose.msk.msra.mxu0 %vm714_vm2, %v1047_v7 }
 0x52d   :  { %v5528_v42 = vpop.eup %5527  ;;  %5259 = vmatprep.subr.mxu0 %v5714_v50 }
 0x52e   :  { %v1048_v8 = vmul.f32 %v5528_v42, %v5520_v54 }
 0x530   :  { %5255 = vmatpush3.xpose.msk.msra.mxu1 %vm714_vm2, %v1048_v8 }
 0x531   :  { %5264 = vmatprep.subr.mxu1 %v5714_v50  ;;  %v5530_v12 = vpop.eup %5529 }
 0x532   :  { %v1049_v24 = vmul.f32 %v5530_v12, %v5522_v56 }
 0x535   :  { %v5532_v25 = vpop.eup %5531 }
 0x536   :  { %v1050_v28 = vmul.f32 %v5532_v25, %v5524_v58  ;;  %v6064_v58 = vsel %vm154_vm4, -1e+09, %v5714_v50 }
 0x543   :  { %v1403_v10 = vpop.trf.xlu0 }
 0x544   :  { %1483 = vxpose.xlu1.b32.start.end [1/1] (short) (narrow) %v1403_v10, 8 }
 0x547   :  { %v1404_v11 = vpop.trf.xlu0 }
 0x548   :  { %1515 = vxpose.xlu0.b32.start.end [1/1] (short) (narrow) %v1404_v11, 8 }
 0x54b   :  { %v1405_v13 = vpop.trf.xlu0 }
 0x54c   :  { %1547 = vxpose.xlu1.b32.start.end [1/1] (short) (narrow) %v1405_v13, 8 }
 0x54d   :  { %v570_v23 = vpop.trf.xlu1 }
 0x54e   :  { %5252 = vmatmul.mubr.msk.f32.vlgmr.msra.gmra.mxu0 %vm714_vm2, %v570_v23 }
 0x54f   :  { %5260 = vmatpush3.xpose.msk.msra.mxu0 %vm714_vm2, %v1049_v24  ;;  %v1406_v26 = vpop.trf.xlu0  ;;  %5261 = vmatprep.mubr.msk.f32.mxu0 %vm5715_vm1, %v5714_v50 }
 0x550   :  { %1579 = vxpose.xlu1.b32.start.end [1/1] (short) (narrow) %v1406_v26, 8  ;;  %5269 = vmatprep.subr.mxu0 %v5714_v50 }
 0x551   :  { %v571_v27 = vpop.trf.xlu1 }
 0x552   :  { %5257 = vmatmul.mubr.msk.f32.vlgmr.msra.gmra.mxu1 %vm714_vm2, %v571_v27 }
 0x553   :  { %5265 = vmatpush3.xpose.msk.msra.mxu1 %vm714_vm2, %v1050_v28  ;;  %v1435_v29 = vpop.trf.xlu0  ;;  %5266 = vmatprep.mubr.msk.f32.mxu1 %vm5715_vm1, %v5714_v50 }
 0x554   :  { %5274 = vmatprep.subr.mxu1 %v5714_v50 }
 0x555   :  { %v572_v31 = vpop.trf.xlu1 }
 0x556   :  { %5262 = vmatmul.mubr.msk.f32.vlgmr.msra.gmra.mxu0 %vm714_vm2, %v572_v31 }
 0x557   :  { %5270 = vmatpush3.msra.mxu0 %v1435_v29  ;;  %5271 = vmatprep.mubr.msk.f32.mxu0 %vm5715_vm1, %v5714_v50  ;;  %v1436_v33 = vpop.trf.xlu0 }
 0x558   :  { %5279 = vmatprep.subr.mxu0 %v5714_v50 }
 0x559   :  { %v573_v34 = vpop.trf.xlu1 }
 0x55a   :  { %5267 = vmatmul.mubr.msk.f32.vlgmr.msra.gmra.mxu1 %vm714_vm2, %v573_v34 }
 0x55b   :  { %5275 = vmatpush3.msra.mxu1 %v1436_v33  ;;  %5276 = vmatprep.mubr.msk.f32.mxu1 %vm5715_vm1, %v5714_v50  ;;  %v1437_v35 = vpop.trf.xlu0 }
 0x55c   :  { %5284 = vmatprep.subr.mxu1 %v5714_v50 }
 0x55f   :  { %v1438_v36 = vpop.trf.xlu0 }
 0x5c0   :  { %v1499_v37 = vpop.trf.xlu1 }
 0x5c1   :  { %5272 = vmatmul.mubr.msk.f32.vlgmr.msra.gmra.mxu0 %vm714_vm2, %v1499_v37 }
 0x5c2   :  { %5280 = vmatpush3.msra.mxu0 %v1437_v35  ;;  %5281 = vmatprep.mubr.msk.f32.mxu0 %vm5715_vm1, %v5714_v50 }
 0x5c3   :  { %5289 = vmatprep.subr.mxu0 %v5714_v50 }
 0x5c4   :  { %v1531_v38 = vpop.trf.xlu0 }
 0x5c5   :  { %5277 = vmatmul.mubr.msk.f32.vlgmr.msra.gmra.mxu1 %vm714_vm2, %v1531_v38 }
 0x5c6   :  { %5285 = vmatpush3.msra.mxu1 %v1438_v36  ;;  %5286 = vmatprep.mubr.msk.f32.mxu1 %vm5715_vm1, %v5714_v50 }
 0x5c7   :  { %5294 = vmatprep.subr.mxu1 %v5714_v50 }
 0x5c8   :  { %v1563_v44 = vpop.trf.xlu1 }
 0x5c9   :  { %5282 = vmatmul.mubr.msk.f32.vlgmr.msra.gmra.mxu0 %vm714_vm2, %v1563_v44 }
 0x5ca   :  { %5291 = vmatprep.mubr.msk.f32.mxu0 %vm5715_vm1, %v5714_v50 }
 0x5cc   :  { %v1595_v45 = vpop.trf.xlu1 }
 0x5cd   :  { %5287 = vmatmul.mubr.msk.f32.vlgmr.msra.gmra.mxu1 %vm714_vm2, %v1595_v45 }
 0x5ce   :  { %5296 = vmatprep.mubr.msk.f32.mxu1 %vm5715_vm1, %v5714_v50 }
 0x60e   :  { %v1123_v48 = vpop.f32.mrf.mxu0 }
 0x610   :  { %v5253_v49 = vpop.f32.mrf.mxu0 }
 0x612   :  { %v1199_v51 = vpop.f32.mrf.mxu1 }
 0x614   :  { %v5258_v52 = vpop.f32.mrf.mxu1 }
 0x616   :  { %v1275_v53 = vpop.f32.mrf.mxu0 }
 0x618   :  { %v5263_v54 = vpop.f32.mrf.mxu0 }
 0x61a   :  { %v1351_v55 = vpop.f32.mrf.mxu1 }
 0x61c   :  { %v5268_v56 = vpop.f32.mrf.mxu1 }
 0x681   :  { %v1680_v59 = vpop.f32.mrf.mxu0 }
 0x682   :  { %v1681_v60 = vadd.f32 %v1680_v59, %v6064_v58 }
 0x683   :  { %v5273_v62 = vpop.f32.mrf.mxu0 }
 0x684   :  { %v1903_v63 = vsel %vm714_vm2, %v1681_v60, -inf }
 0x685   :  { %1904 = vmax.xlane.f32.xlu0 %v1903_v63  ;;  %v1753_v3 = vpop.f32.mrf.mxu1 }
 0x686   :  { %v1754_v4 = vadd.f32 %v1753_v3, %v6064_v58 }
 0x687   :  { %v5278_v6 = vpop.f32.mrf.mxu1 }
 0x688   :  { %v1906_v7 = vsel %vm714_vm2, %v1754_v4, -inf }
 0x689   :  { %v1826_v42 = vpop.f32.mrf.mxu0  ;;  %1907 = vmax.xlane.f32.xlu1 %v1906_v7 }
 0x68a   :  { %v1827_v8 = vadd.f32 %v1826_v42, %v6064_v58 }
 0x68b   :  { %v5283_v9 = vpop.f32.mrf.mxu0 }
 0x68c   :  { %v1909_v46 = vsel %vm714_vm2, %v1827_v8, -inf }
 0x68d   :  { %1910 = vmax.xlane.f32.xlu1 %v1909_v46  ;;  %v1899_v10 = vpop.f32.mrf.mxu1  ;;  %v6094_v46 = vld [vmem:[#allocation7 + $0x18] sm:$0xff] }
 0x68e   :  { %v1900_v11 = vadd.f32 %v1899_v10, %v6064_v58  ;;  %v6096_v10 = vld [vmem:[#allocation7 + $0x10] sm:$0xff] }
 0x68f   :  { %v5288_v12 = vpop.f32.mrf.mxu1 }
 0x690   :  { %v1912_v13 = vsel %vm714_vm2, %v1900_v11, -inf  ;;  %v6101_v12 = vld [vmem:[#allocation7 + $0x8] sm:$0xff] }
 0x691   :  { %1913 = vmax.xlane.f32.xlu1 %v1912_v13  ;;  %v6105_v13 = vld [vmem:[#allocation7] sm:$0xff] }
 0x70e   :  { %v1905_v23 = vpop.xlane.xlu0 %1904 }
 0x70f   :  { %v1915_v24 = vsub.f32 %v1681_v60, %v1905_v23 }
 0x711   :  { %v1919_v25 = vmul.f32 1.442695, %v1915_v24 }
 0x712   :  { %v1908_v26 = vpop.xlane.xlu1 %1907 }
 0x713   :  { %5533 = vpow2.f32 %v1919_v25  ;;  %v1916_v27 = vsub.f32 %v1754_v4, %v1908_v26 }
 0x715   :  { %v1921_v28 = vmul.f32 1.442695, %v1916_v27 }
 0x716   :  { %v1911_v29 = vpop.xlane.xlu1 %1910 }
 0x717   :  { %5535 = vpow2.f32 %v1921_v28  ;;  %v1917_v31 = vsub.f32 %v1827_v8, %v1911_v29 }
 0x719   :  { %v1923_v33 = vmul.f32 1.442695, %v1917_v31 }
 0x71a   :  { %v1914_v34 = vpop.xlane.xlu1 %1913 }
 0x71b   :  { %5537 = vpow2.f32 %v1923_v33  ;;  %v1918_v35 = vsub.f32 %v1900_v11, %v1914_v34  ;;  %v6115_v34 = vld [vmem:[%s6483_s9] ss:$0 sm:$0xff] }
 0x71d   :  { %v1925_v36 = vmul.f32 1.442695, %v1918_v35 }
 0x71f   :  { %5539 = vpow2.f32 %v1925_v36 }
 0x720   :  { %v5534_v37 = vpop.eup %5533 }
 0x721   :  { %v1927_v38 = vsel %vm714_vm2, %v5534_v37, 0.0 }
 0x722   :  { %1928 = vadd.xlane.f32.xlu0 %v1927_v38 }
 0x724   :  { %v5536_v44 = vpop.eup %5535 }
 0x725   :  { %v1930_v45 = vsel %vm714_vm2, %v5536_v44, 0.0 }
 0x726   :  { %1931 = vadd.xlane.f32.xlu1 %v1930_v45 }
 0x728   :  { %v5538_v49 = vpop.eup %5537 }
 0x729   :  { %v1933_v52 = vsel %vm714_vm2, %v5538_v49, 0.0 }
 0x72a   :  { %1934 = vadd.xlane.f32.xlu0 %v1933_v52 }
 0x72c   :  { %v5540_v54 = vpop.eup %5539 }
 0x72d   :  { %v1936_v56 = vsel %vm714_vm2, %v5540_v54, 0.0 }
 0x72e   :  { %1937 = vadd.xlane.f32.xlu1 %v1936_v56 }
 0x757   :  { %1451 = vxpose.xlu0.b32.start.end [1/1] (short) (narrow) %v487_v57, 32 }
 0x761   :  { %1355 = vxpose.xlu1.b32.start [1/4] (short) (narrow) %v1123_v48, 8 }
 0x765   :  { %1356 = vxpose.xlu1.b32.cont [2/4] (short) (narrow) %v1199_v51, 8 }
 0x769   :  { %1357 = vxpose.xlu1.b32.cont [3/4] (short) (narrow) %v1275_v53, 8 }
 0x76d   :  { %1358 = vxpose.xlu1.b32.end [4/4] (short) (narrow) %v1351_v55, 8 }
 0x7ab   :  { %v1929_v59 = vpop.xlane.xlu0 %1928 }
 0x7ac   :  { %5541 = vrcp.f32 %v1929_v59 }
 0x7af   :  { %v1932_v60 = vpop.xlane.xlu1 %1931 }
 0x7b0   :  { %5543 = vrcp.f32 %v1932_v60 }
 0x7b3   :  { %v1935_v6 = vpop.xlane.xlu0 %1934 }
 0x7b4   :  { %5545 = vrcp.f32 %v1935_v6  ;;  %v6137_v6 = vld [vmem:[#allocation8 + $0x10] sm:$0xff] }
 0x7b7   :  { %v1938_v5 = vpop.xlane.xlu1 %1937 }
 0x7b8   :  { %5547 = vrcp.f32 %v1938_v5  ;;  %v6139_v5 = vld [vmem:[#allocation8 + $0x8] sm:$0xff] }
 0x7b9   :  { %v5542_v62 = vpop.eup %5541 }
 0x7ba   :  { %v1943_v63 = vmul.f32 %v5542_v62, %v5534_v37 }
 0x7bc   :  { %5290 = vmatpush3.xpose.msk.msra.mxu0 %vm714_vm2, %v1943_v63 }
 0x7bd   :  { %v5544_v3 = vpop.eup %5543  ;;  %5299 = vmatprep.subr.mxu0 %v5714_v50 }
 0x7be   :  { %v1944_v4 = vmul.f32 %v5544_v3, %v5536_v44 }
 0x7c0   :  { %5295 = vmatpush3.xpose.msk.msra.mxu1 %vm714_vm2, %v1944_v4  ;;  %v6133_v4 = vld [vmem:[#allocation8 + $0x18] sm:$0xff] }
 0x7c1   :  { %5304 = vmatprep.subr.mxu1 %v5714_v50  ;;  %v5546_v48 = vpop.eup %5545 }
 0x7c2   :  { %v1945_v53 = vmul.f32 %v5546_v48, %v5538_v49  ;;  %v6143_v48 = vld [vmem:[#allocation8] sm:$0xff] }
 0x7c5   :  { %v5548_v55 = vpop.eup %5547 }
 0x7c6   :  { %v1946_v42 = vmul.f32 %v5548_v55, %v5540_v54  ;;  %v6165_v55 = vld [vmem:[%s6490_s16 + $0x28] sm:$0xff] }
 0x7d3   :  { %v1467_v51 = vpop.trf.xlu0 }
 0x7d4   :  { %5292 = vmatmul.mubr.msk.f32.vlgmr.msra.gmra.mxu0 %vm714_vm2, %v1467_v51  ;;  %v6152_v51 = vld [vmem:[%s6490_s16 + $0x38] sm:$0xff] }
 0x7d5   :  { %5300 = vmatpush3.xpose.msk.msra.mxu0 %vm714_vm2, %v1945_v53  ;;  %5301 = vmatprep.mubr.msk.f32.mxu0 %vm5715_vm1, %v5714_v50  ;;  %v6157_v53 = vld [vmem:[%s6490_s16 + $0x30] sm:$0xff] }
 0x7d6   :  { %5309 = vmatprep.subr.mxu0 %v6094_v46 }
 0x7d7   :  { %v1468_v7 = vpop.trf.xlu0 }
 0x7d8   :  { %5297 = vmatmul.mubr.msk.f32.vlgmr.msra.gmra.mxu1 %vm714_vm2, %v1468_v7  ;;  %v6172_v7 = vld [vmem:[%s6490_s16 + $0x20] sm:$0xff] }
 0x7d9   :  { %5305 = vmatpush3.xpose.msk.msra.mxu1 %vm714_vm2, %v1946_v42  ;;  %5306 = vmatprep.mubr.msk.f32.mxu1 %vm5715_vm1, %v5714_v50 }
 0x7da   :  { %5320 = vmatprep.subr.mxu1 %v6133_v4 }
 0x7db   :  { %v1469_v8 = vpop.trf.xlu0 }
 0x7dc   :  { %5302 = vmatmul.mubr.msk.f32.vlgmr.msra.gmra.mxu0 %vm714_vm2, %v1469_v8 }
 0x7dd   :  { %v1371_v11 = vpop.trf.xlu1  ;;  %5310 = vmatpush3.msra.mxu0 %v6094_v46 }
 0x7de   :  { %5317 = vmatprep.mubr.msk.f32.mxu0 %vm227_vm0, %v1371_v11  ;;  %5311 = vmatprep.subr.mxu0 %v6096_v10 }
 0x7df   :  { %v1470_v9 = vpop.trf.xlu0  ;;  %5312 = vmatpush3.msra.mxu0 %v6096_v10 }
 0x7e0   :  { %5307 = vmatmul.mubr.msk.f32.vlgmr.msra.gmra.mxu1 %vm714_vm2, %v1470_v9  ;;  %5313 = vmatprep.subr.mxu0 %v6101_v12 }
 0x7e1   :  { %5314 = vmatpush3.msra.mxu0 %v6101_v12  ;;  %5321 = vmatpush3.msra.mxu1 %v6133_v4 }
 0x7e2   :  { %5315 = vmatprep.subr.mxu0 %v6105_v13  ;;  %5322 = vmatprep.subr.mxu1 %v6137_v6 }
 0x7e3   :  { %5316 = vmatpush3.msra.mxu0 %v6105_v13  ;;  %5323 = vmatpush3.msra.mxu1 %v6137_v6 }
 0x7e4   :  { %5324 = vmatprep.subr.mxu1 %v6139_v5  ;;  %5331 = vmatprep.subr.mxu0 %v6152_v51 }
 0x7e5   :  { %5325 = vmatpush3.msra.mxu1 %v6139_v5 }
 0x7e6   :  { %5326 = vmatprep.subr.mxu1 %v6143_v48 }
 0x7e7   :  { %5327 = vmatpush3.msra.mxu1 %v6143_v48 }
 0x7e8   :  { %5350 = vmatprep.subr.mxu1 %v5861_v14 }
 0x894   :  { %v2019_v23 = vpop.f32.mrf.mxu0 }
 0x895   :  { %2251 = vxpose.xlu0.b32.start [1/4] (short) (narrow) %v2019_v23, 8 }
 0x896   :  { %v5293_v24 = vpop.f32.mrf.mxu0 }
 0x898   :  { %v2095_v25 = vpop.f32.mrf.mxu1 }
 0x899   :  { %2252 = vxpose.xlu0.b32.cont [2/4] (short) (narrow) %v2095_v25, 8 }
 0x89a   :  { %v5298_v26 = vpop.f32.mrf.mxu1 }
 0x89b   :  { %v6181_v26 = vld [vmem:[%s6486_s12] ss:$0 sm:$0xff] }
 0x89c   :  { %v2171_v27 = vpop.f32.mrf.mxu0 }
 0x89d   :  { %2253 = vxpose.xlu0.b32.cont [3/4] (short) (narrow) %v2171_v27, 8 }
 0x89e   :  { %v5303_v28 = vpop.f32.mrf.mxu0 }
 0x89f   :  { %v6186_v28 = vld [vmem:[%s6487_s13] ss:$0 sm:$0xff] }
 0x8a0   :  { %v2247_v29 = vpop.f32.mrf.mxu1 }
 0x8a1   :  { %2254 = vxpose.xlu0.b32.end [4/4] (short) (narrow) %v2247_v29, 8 }
 0x8a2   :  { %v5308_v31 = vpop.f32.mrf.mxu1 }
 0x911   :  { %v2267_v33 = vpop.trf.xlu0 }
 0x912   :  { %5318 = vmatmul.mubr.msk.f32.vlgmr.msra.gmra.mxu0 %vm227_vm0, %v2267_v33 }
 0x913   :  { %5332 = vmatpush3.msra.mxu0 %v6152_v51 }
 0x914   :  { %5333 = vmatprep.subr.mxu0 %v6157_v53 }
 0x915   :  { %5334 = vmatpush3.msra.mxu0 %v6157_v53 }
 0x916   :  { %5335 = vmatprep.subr.mxu0 %v6165_v55 }
 0x917   :  { %5336 = vmatpush3.msra.mxu0 %v6165_v55 }
 0x918   :  { %5337 = vmatprep.subr.mxu0 %v6172_v7 }
 0x919   :  { %5338 = vmatpush3.msra.mxu0 %v6172_v7 }
 0x9d2   :  { %v5319_v35 = vpop.f32.mrf.mxu0 }
 0x9d3   :  { %v2365_v36 = vadd.f32 %v5319_v35, %v5848_v1 }
 0x9d4   :  { %v2355_v37 = vpop.f32.mrf.mxu0 }
 0x9d5   :  { %v6119_v38 = vadd.f32 %v6115_v34, %v2365_v36  ;;  %v2364_v44 = vadd.f32 %v2355_v37, %v5846_v0 }
 0x9d7   :  { %v6123_v45 = vadd.f32 %v6115_v34, %v2364_v44  ;;  %v2371_v49 = vsel %vm227_vm0, %v6119_v38, 0.0  ;;  %v6205_v44 = vld [vmem:[%s6490_s16 + $0x18] sm:$0xff] }
 0x9d8   :  { %2372 = vadd.xlane.f32.xlu0 %v2371_v49  ;;  %5339 = vmatprep.subr.mxu0 %v6205_v44 }
 0x9d9   :  { %v2368_v52 = vsel %vm227_vm0, %v6123_v45, 0.0  ;;  %5340 = vmatpush3.msra.mxu0 %v6205_v44 }
 0x9da   :  { %2369 = vadd.xlane.f32.xlu1 %v2368_v52 }
 0xa61   :  { %v2373_v54 = vpop.xlane.xlu0 %2372 }
 0xa62   :  { %v2375_v56 = vmul.f32 0.03125, %v2373_v54 }
 0xa63   :  { %v2370_v1 = vpop.xlane.xlu1 %2369 }
 0xa64   :  { %v2374_v57 = vmul.f32 0.03125, %v2370_v1  ;;  %v2377_v59 = vsub.f32 %v6119_v38, %v2375_v56 }
 0xa66   :  { %v2376_v60 = vsub.f32 %v6123_v45, %v2374_v57  ;;  %v2379_v63 = vmul.f32 %v2377_v59, %v2377_v59 }
 0xa68   :  { %v2378_v0 = vmul.f32 %v2376_v60, %v2376_v60  ;;  %v2383_v3 = vsel %vm227_vm0, %v2379_v63, 0.0 }
 0xa6a   :  { %v2380_v62 = vsel %vm227_vm0, %v2378_v0, 0.0 }
 0xa6b   :  { %2381 = vadd.xlane.f32.xlu1 %v2380_v62 }
 0xa6f   :  { %2384 = vadd.xlane.f32.xlu1 %v2383_v3 }
 0xaf4   :  { %v2382_v42 = vpop.xlane.xlu1 %2381 }
 0xaf5   :  { %v2386_v8 = vmul.f32 0.03125, %v2382_v42 }
 0xaf7   :  { %v2388_v9 = vadd.f32 1e-05, %v2386_v8 }
 0xaf8   :  { %v2385_v11 = vpop.xlane.xlu1 %2384 }
 0xaf9   :  { %5549 = vrsqrt.f32 %v2388_v9  ;;  %v2387_v23 = vmul.f32 0.03125, %v2385_v11 }
 0xafb   :  { %v2389_v24 = vadd.f32 1e-05, %v2387_v23 }
 0xafd   :  { %5551 = vrsqrt.f32 %v2389_v24 }
 0xb06   :  { %v5550_v25 = vpop.eup %5549 }
 0xb07   :  { %v2392_v27 = vmul.f32 %v5550_v25, %v2376_v60 }
 0xb09   :  { %v2394_v29 = vmul.f32 %v6181_v26, %v2392_v27 }
 0xb0a   :  { %v5552_v31 = vpop.eup %5551 }
 0xb0b   :  { %v2393_v33 = vmul.f32 %v5552_v31, %v2377_v59  ;;  %v2396_v35 = vadd.f32 %v6186_v28, %v2394_v29  ;;  %v6251_v59 = vld [vmem:[%s6491_s17] ss:$0 sm:$0xff] }
 0xb0d   :  { %5328 = vmatprep.mubr.msk.f32.mxu1 %vm227_vm0, %v2396_v35  ;;  %v2395_v36 = vmul.f32 %v6181_v26, %v2393_v33 }
 0xb0f   :  { %v2397_v37 = vadd.f32 %v6186_v28, %v2395_v36 }
 0xb11   :  { %5329 = vmatmul.mubr.msk.f32.vlgmr.msra.gmra.mxu1 %vm227_vm0, %v2397_v37 }
 0xb12   :  { %5351 = vmatpush3.msra.mxu1 %v5861_v14  ;;  %v6212_v14 = vld [vmem:[%s6490_s16 + $0x10] sm:$0xff] }
 0xb13   :  { %5352 = vmatprep.subr.mxu1 %v5871_v16  ;;  %5341 = vmatprep.subr.mxu0 %v6212_v14 }
 0xb14   :  { %5353 = vmatpush3.msra.mxu1 %v5871_v16  ;;  %5342 = vmatpush3.msra.mxu0 %v6212_v14  ;;  %v6219_v16 = vld [vmem:[%s6490_s16 + $0x8] sm:$0xff] }
 0xb15   :  { %5354 = vmatprep.subr.mxu1 %v5885_v18  ;;  %5343 = vmatprep.subr.mxu0 %v6219_v16 }
 0xb16   :  { %5355 = vmatpush3.msra.mxu1 %v5885_v18  ;;  %v6225_v18 = vld [vmem:[%s6490_s16] sm:$0xff]  ;;  %5344 = vmatpush3.msra.mxu0 %v6219_v16 }
 0xb17   :  { %5356 = vmatprep.subr.mxu1 %v5902_v20  ;;  %5345 = vmatprep.subr.mxu0 %v6225_v18 }
 0xb18   :  { %5357 = vmatpush3.msra.mxu1 %v5902_v20  ;;  %5346 = vmatpush3.msra.mxu0 %v6225_v18  ;;  %v6234_v20 = vld [vmem:[%s6489_s15] ss:$0 sm:$0xff] }
 0xb19   :  { %5361 = vmatprep.subr.mxu1 %v5912_v22  ;;  %5372 = vmatprep.subr.mxu0 %v5866_v15 }
 0xbd1   :  { %v5330_v49 = vpop.f32.mrf.mxu1 }
 0xbd2   :  { %v2476_v52 = vadd.f32 %v5330_v49, %v6234_v20 }
 0xbd3   :  { %v2470_v54 = vpop.f32.mrf.mxu1 }
 0xbd4   :  { %v2471_v56 = vadd.f32 %v6234_v20, %v2470_v54  ;;  %v2480_v57 = vmax.f32 %v2476_v52, 0.0 }
 0xbd6   :  { %v2479_v1 = vmax.f32 %v2471_v56, 0.0 }
 0xbd8   :  { %5347 = vmatprep.mubr.msk.f32.mxu0 %vm2481_vm5, %v2479_v1 }
 0xbd9   :  { %5348 = vmatmul.mubr.msk.f32.vlgmr.msra.gmra.mxu0 %vm2481_vm5, %v2480_v57 }
 0xbda   :  { %5373 = vmatpush3.msra.mxu0 %v5866_v15 }
 0xbdb   :  { %5374 = vmatprep.subr.mxu0 %v5878_v17 }
 0xbdc   :  { %5375 = vmatpush3.msra.mxu0 %v5878_v17 }
 0xbdd   :  { %5376 = vmatprep.subr.mxu0 %v5896_v19 }
 0xbde   :  { %5377 = vmatpush3.msra.mxu0 %v5896_v19 }
 0xbdf   :  { %5378 = vmatprep.subr.mxu0 %v5907_v21 }
 0xbe0   :  { %5379 = vmatpush3.msra.mxu0 %v5907_v21 }
 0xbe1   :  { %5393 = vmatprep.subr.mxu0 %v5714_v50 }
 0xc99   :  { %v5349_v15 = vpop.f32.mrf.mxu0 }
 0xc9a   :  { %v2564_v60 = vadd.f32 %v5349_v15, %v6119_v38 }
 0xc9b   :  { %v2554_v0 = vpop.f32.mrf.mxu0 }
 0xc9c   :  { %v6255_v17 = vadd.f32 %v6251_v59, %v2564_v60  ;;  %v2563_v19 = vadd.f32 %v2554_v0, %v6123_v45 }
 0xc9e   :  { %v6259_v62 = vadd.f32 %v6251_v59, %v2563_v19  ;;  %v2570_v21 = vsel %vm227_vm0, %v6255_v17, 0.0 }
 0xc9f   :  { %2571 = vadd.xlane.f32.xlu0 %v2570_v21 }
 0xca0   :  { %v2567_v63 = vsel %vm227_vm0, %v6259_v62, 0.0 }
 0xca1   :  { %2568 = vadd.xlane.f32.xlu1 %v2567_v63 }
 0xd28   :  { %v2572_v3 = vpop.xlane.xlu0 %2571 }
 0xd29   :  { %v2574_v42 = vmul.f32 0.03125, %v2572_v3 }
 0xd2a   :  { %v2569_v38 = vpop.xlane.xlu1 %2568 }
 0xd2b   :  { %v2576_v8 = vsub.f32 %v6255_v17, %v2574_v42  ;;  %v2573_v9 = vmul.f32 0.03125, %v2569_v38 }
 0xd2d   :  { %v2575_v11 = vsub.f32 %v6259_v62, %v2573_v9  ;;  %v2578_v45 = vmul.f32 %v2576_v8, %v2576_v8 }
 0xd2f   :  { %v2582_v23 = vsel %vm227_vm0, %v2578_v45, 0.0  ;;  %v2577_v24 = vmul.f32 %v2575_v11, %v2575_v11 }
 0xd30   :  { %2583 = vadd.xlane.f32.xlu0 %v2582_v23 }
 0xd31   :  { %v2579_v25 = vsel %vm227_vm0, %v2577_v24, 0.0 }
 0xd32   :  { %2580 = vadd.xlane.f32.xlu1 %v2579_v25 }
 0xdb9   :  { %v2584_v27 = vpop.xlane.xlu0 %2583 }
 0xdba   :  { %v2586_v29 = vmul.f32 0.03125, %v2584_v27 }
 0xdbb   :  { %v2581_v31 = vpop.xlane.xlu1 %2580 }
 0xdbc   :  { %v2588_v33 = vadd.f32 1e-05, %v2586_v29  ;;  %v2585_v35 = vmul.f32 0.03125, %v2581_v31 }
 0xdbe   :  { %5553 = vrsqrt.f32 %v2588_v33  ;;  %v2587_v36 = vadd.f32 1e-05, %v2585_v35 }
 0xdc0   :  { %5555 = vrsqrt.f32 %v2587_v36 }
 0xdcb   :  { %v5554_v37 = vpop.eup %5553 }
 0xdcc   :  { %v2592_v49 = vmul.f32 %v5554_v37, %v2576_v8 }
 0xdcd   :  { %v5556_v52 = vpop.eup %5555 }
 0xdce   :  { %v2591_v54 = vmul.f32 %v5556_v52, %v2575_v11  ;;  %v2594_v56 = vmul.f32 %v5923_v30, %v2592_v49 }
 0xdd0   :  { %v2593_v1 = vmul.f32 %v5923_v30, %v2591_v54  ;;  %v2596_v15 = vadd.f32 %v5928_v32, %v2594_v56 }
 0xdd2   :  { %v2595_v57 = vadd.f32 %v5928_v32, %v2593_v1 }
 0xdd4   :  { %5358 = vmatprep.mubr.msk.f32.mxu1 %vm227_vm0, %v2595_v57  ;;  %5380 = vmatprep.mubr.msk.f32.mxu0 %vm227_vm0, %v2595_v57 }
 0xdd5   :  { %5359 = vmatmul.mubr.msk.f32.vlgmr.msra.gmra.mxu1 %vm227_vm0, %v2596_v15  ;;  %5381 = vmatmul.mubr.msk.f32.vlgmr.msra.gmra.mxu0 %vm227_vm0, %v2596_v15 }
 0xdd6   :  { %5362 = vmatpush3.msra.mxu1 %v5912_v22  ;;  %5369 = vmatprep.mubr.msk.f32.mxu1 %vm227_vm0, %v2595_v57 }
 0xdd7   :  { %5363 = vmatprep.subr.mxu1 %v5939_v39  ;;  %5395 = vmatprep.mubr.msk.f32.mxu0 %vm5715_vm1, %v5714_v50 }
 0xdd8   :  { %5364 = vmatpush3.msra.mxu1 %v5939_v39 }
 0xdd9   :  { %5365 = vmatprep.subr.mxu1 %v5948_v40 }
 0xdda   :  { %5366 = vmatpush3.msra.mxu1 %v5948_v40 }
 0xddb   :  { %5367 = vmatprep.subr.mxu1 %v5955_v41 }
 0xddc   :  { %5368 = vmatpush3.msra.mxu1 %v5955_v41 }
 0xddd   :  { %5370 = vmatmul.mubr.msk.f32.vlgmr.msra.gmra.mxu1 %vm227_vm0, %v2596_v15  ;;  %5383 = vmatprep.subr.mxu1 %v5714_v50 }
 0xdde   :  { %5385 = vmatprep.mubr.msk.f32.mxu1 %vm5715_vm1, %v5714_v50 }
 0xe95   :  { %v6291_v22 = vpop.f32.mrf.mxu1  ;;  %v6314_v23 = vpop.f32.mrf.mxu0 }
 0xe97   :  { %v2669_v30 = vpop.f32.mrf.mxu1  ;;  %v2819_v31 = vpop.f32.mrf.mxu0 }
 0xe98   :  { %v2670_v32 = vadd.f32 %v5967_v43, %v2669_v30 }
 0xe9a   :  { %2828 = vxpose.xlu1.b32.start.end [1/1] (short) (narrow) %v2670_v32, 32 }
 0xe9d   :  { %v6294_v39 = vpop.f32.mrf.mxu1 }
 0xe9f   :  { %v2744_v40 = vpop.f32.mrf.mxu1 }
 0xea0   :  { %v2745_v60 = vadd.f32 %v5975_v47, %v2744_v40 }
 0xea2   :  { %2860 = vxpose.xlu0.b32.start.end [1/1] (short) (narrow) %v2745_v60, 32 }
 0xf16   :  { %v2844_v41 = vpop.trf.xlu1 }
 0xf17   :  { %2924 = vxpose.xlu0.b32.start.end [1/1] (short) (narrow) %v2844_v41, 8 }
 0xf1a   :  { %v2845_v0 = vpop.trf.xlu1 }
 0xf1b   :  { %2956 = vxpose.xlu1.b32.start.end [1/1] (short) (narrow) %v2845_v0, 8 }
 0xf1e   :  { %v2846_v19 = vpop.trf.xlu1  ;;  %v2876_v21 = vpop.trf.xlu0 }
 0xf1f   :  { %2988 = vxpose.xlu0.b32.start.end [1/1] (short) (narrow) %v2846_v19, 8  ;;  %5384 = vmatpush3.msra.mxu1 %v2876_v21 }
 0xf20   :  { %5388 = vmatprep.subr.mxu1 %v5714_v50 }
 0xf22   :  { %v2847_v63 = vpop.trf.xlu1  ;;  %v2877_v3 = vpop.trf.xlu0 }
 0xf23   :  { %3020 = vxpose.xlu0.b32.start.end [1/1] (short) (narrow) %v2847_v63, 8 }
 0xf26   :  { %v2878_v43 = vpop.trf.xlu0 }
 0xf27   :  { %5394 = vmatpush3.msra.mxu0 %v2878_v43 }
 0xf28   :  { %5403 = vmatprep.subr.mxu0 %v5714_v50 }
 0xf2a   :  { %v2879_v42 = vpop.trf.xlu0 }
 0xf93   :  { %v2940_v47 = vpop.trf.xlu0 }
 0xf94   :  { %5386 = vmatmul.mubr.msk.f32.vlgmr.msra.gmra.mxu1 %vm714_vm2, %v2940_v47 }
 0xf95   :  { %5389 = vmatpush3.msra.mxu1 %v2877_v3  ;;  %5390 = vmatprep.mubr.msk.f32.mxu1 %vm5715_vm1, %v5714_v50 }
 0xf96   :  { %5398 = vmatprep.subr.mxu1 %v5714_v50 }
 0xf97   :  { %v2972_v38 = vpop.trf.xlu1 }
 0xf98   :  { %5391 = vmatmul.mubr.msk.f32.vlgmr.msra.gmra.mxu1 %vm714_vm2, %v2972_v38 }
 0xf99   :  { %5399 = vmatpush3.msra.mxu1 %v2879_v42  ;;  %5400 = vmatprep.mubr.msk.f32.mxu1 %vm5715_vm1, %v5714_v50 }
 0xf9a   :  { %5408 = vmatprep.subr.mxu1 %v5714_v50 }
 0xf9b   :  { %v3004_v8 = vpop.trf.xlu0 }
 0xf9c   :  { %5396 = vmatmul.mubr.msk.f32.vlgmr.msra.gmra.mxu0 %vm714_vm2, %v3004_v8 }
 0xf9d   :  { %5405 = vmatprep.mubr.msk.f32.mxu0 %vm5715_vm1, %v5714_v50 }
 0xf9f   :  { %v3036_v9 = vpop.trf.xlu0 }
 0xfa0   :  { %5401 = vmatmul.mubr.msk.f32.vlgmr.msra.gmra.mxu1 %vm714_vm2, %v3036_v9 }
 0xfa1   :  { %5410 = vmatprep.mubr.msk.f32.mxu1 %vm5715_vm1, %v5714_v50 }
0x1054   :  { %v3121_v11 = vpop.f32.mrf.mxu1 }
0x1055   :  { %v3122_v45 = vadd.f32 %v3121_v11, %v6001_v2 }
0x1056   :  { %v5387_v24 = vpop.f32.mrf.mxu1 }
0x1057   :  { %v3344_v25 = vsel %vm714_vm2, %v3122_v45, -inf  ;;  %v2820_v24 = vadd.f32 %v6022_v61, %v2819_v31 }
0x1058   :  { %3345 = vmax.xlane.f32.xlu1 %v3344_v25  ;;  %v3194_v27 = vpop.f32.mrf.mxu1  ;;  %v5597_v25 = vld [vmem:[%s6507_s4] ss:$0 sm:$0xff] }
0x1059   :  { %v3195_v29 = vadd.f32 %v3194_v27, %v6001_v2  ;;  %v2675_v27 = vadd.f32 %v5597_v25, %v6291_v22 }
0x105a   :  { %v5392_v33 = vpop.f32.mrf.mxu1 }
0x105b   :  { %v3347_v35 = vsel %vm714_vm2, %v3195_v29, -inf }
0x105c   :  { %v3267_v36 = vpop.f32.mrf.mxu0  ;;  %3348 = vmax.xlane.f32.xlu0 %v3347_v35 }
0x105d   :  { %v3268_v37 = vadd.f32 %v3267_v36, %v6001_v2 }
0x105e   :  { %v5397_v49 = vpop.f32.mrf.mxu0 }
0x105f   :  { %v3350_v52 = vsel %vm714_vm2, %v3268_v37, -inf }
0x1060   :  { %3351 = vmax.xlane.f32.xlu1 %v3350_v52  ;;  %v3340_v54 = vpop.f32.mrf.mxu1 }
0x1061   :  { %v3341_v56 = vadd.f32 %v3340_v54, %v6001_v2 }
0x1062   :  { %v5402_v1 = vpop.f32.mrf.mxu1 }
0x1063   :  { %v3353_v57 = vsel %vm714_vm2, %v3341_v56, -inf }
0x1064   :  { %3354 = vmax.xlane.f32.xlu1 %v3353_v57 }
0x10e1   :  { %v3346_v15 = vpop.xlane.xlu1 %3345 }
0x10e2   :  { %v3356_v30 = vsub.f32 %v3122_v45, %v3346_v15 }
0x10e4   :  { %v3360_v32 = vmul.f32 1.442695, %v3356_v30 }
0x10e5   :  { %v3349_v40 = vpop.xlane.xlu0 %3348 }
0x10e6   :  { %5557 = vpow2.f32 %v3360_v32  ;;  %v3357_v60 = vsub.f32 %v3195_v29, %v3349_v40  ;;  %v5598_v29 = vld [vmem:[%s6479_s5] ss:$0 sm:$0xff] }
0x10e7   :  { %v2750_v33 = vadd.f32 %v5598_v29, %v6294_v39 }
0x10e8   :  { %v3362_v41 = vmul.f32 1.442695, %v3357_v60 }
0x10e9   :  { %v3352_v0 = vpop.xlane.xlu1 %3351 }
0x10ea   :  { %5559 = vpow2.f32 %v3362_v41  ;;  %v3358_v19 = vsub.f32 %v3268_v37, %v3352_v0 }
0x10ec   :  { %v3364_v21 = vmul.f32 1.442695, %v3358_v19 }
0x10ed   :  { %v3355_v63 = vpop.xlane.xlu1 %3354 }
0x10ee   :  { %5561 = vpow2.f32 %v3364_v21  ;;  %v3359_v3 = vsub.f32 %v3341_v56, %v3355_v63 }
0x10f0   :  { %v3366_v43 = vmul.f32 1.442695, %v3359_v3 }
0x10f2   :  { %5563 = vpow2.f32 %v3366_v43 }
0x10f3   :  { %v5558_v2 = vpop.eup %5557 }
0x10f4   :  { %v3368_v42 = vsel %vm714_vm2, %v5558_v2, 0.0 }
0x10f5   :  { %3369 = vadd.xlane.f32.xlu1 %v3368_v42 }
0x10f7   :  { %v5560_v47 = vpop.eup %5559 }
0x10f8   :  { %v3371_v38 = vsel %vm714_vm2, %v5560_v47, 0.0 }
0x10f9   :  { %3372 = vadd.xlane.f32.xlu0 %v3371_v38 }
0x10fb   :  { %v5562_v8 = vpop.eup %5561 }
0x10fc   :  { %v3374_v9 = vsel %vm714_vm2, %v5562_v8, 0.0 }
0x10fd   :  { %3375 = vadd.xlane.f32.xlu1 %v3374_v9 }
0x10ff   :  { %v5564_v11 = vpop.eup %5563 }
0x1100   :  { %v3377_v45 = vsel %vm714_vm2, %v5564_v11, 0.0 }
0x1101   :  { %3378 = vadd.xlane.f32.xlu0 %v3377_v45 }
0x112e   :  { %2892 = vxpose.xlu0.b32.start.end [1/1] (short) (narrow) %v2820_v24, 32 }
0x1130   :  { %3724 = vxpose.xlu1.b32.start.end [1/1] (short) (narrow) %v2675_v27, 32 }
0x113b   :  { %3756 = vxpose.xlu0.b32.start.end [1/1] (short) (narrow) %v2750_v33, 32 }
0x117e   :  { %v3370_v35 = vpop.xlane.xlu1 %3369 }
0x117f   :  { %5565 = vrcp.f32 %v3370_v35 }
0x1182   :  { %v3373_v36 = vpop.xlane.xlu0 %3372 }
0x1183   :  { %5567 = vrcp.f32 %v3373_v36 }
0x1186   :  { %v3376_v49 = vpop.xlane.xlu1 %3375 }
0x1187   :  { %5569 = vrcp.f32 %v3376_v49 }
0x118a   :  { %v3379_v39 = vpop.xlane.xlu0 %3378 }
0x118b   :  { %5571 = vrcp.f32 %v3379_v39 }
0x118c   :  { %v5566_v61 = vpop.eup %5565 }
0x118d   :  { %v3384_v31 = vmul.f32 %v5566_v61, %v5558_v2 }
0x118f   :  { %5404 = vmatpush3.xpose.msk.msra.mxu0 %vm714_vm2, %v3384_v31 }
0x1190   :  { %v5568_v37 = vpop.eup %5567  ;;  %5413 = vmatprep.subr.mxu0 %v5714_v50 }
0x1191   :  { %v3385_v22 = vmul.f32 %v5568_v37, %v5560_v47 }
0x1193   :  { %5409 = vmatpush3.xpose.msk.msra.mxu1 %vm714_vm2, %v3385_v22 }
0x1194   :  { %5418 = vmatprep.subr.mxu1 %v5714_v50  ;;  %v5570_v52 = vpop.eup %5569 }
0x1195   :  { %v3386_v56 = vmul.f32 %v5570_v52, %v5562_v8 }
0x1198   :  { %v5572_v1 = vpop.eup %5571 }
0x1199   :  { %v3387_v30 = vmul.f32 %v5572_v1, %v5564_v11 }
0x11aa   :  { %v2908_v54 = vpop.trf.xlu0 }
0x11ab   :  { %5406 = vmatmul.mubr.msk.f32.vlgmr.msra.gmra.mxu0 %vm714_vm2, %v2908_v54 }
0x11ac   :  { %5414 = vmatpush3.xpose.msk.msra.mxu0 %vm714_vm2, %v3386_v56  ;;  %v3740_v57 = vpop.trf.xlu1  ;;  %5415 = vmatprep.mubr.msk.f32.mxu0 %vm5715_vm1, %v5714_v50 }
0x11ad   :  { %3820 = vxpose.xlu1.b32.start.end [1/1] (short) (narrow) %v3740_v57, 8  ;;  %5423 = vmatprep.subr.mxu0 %v5714_v50 }
0x11ae   :  { %v2909_v15 = vpop.trf.xlu0 }
0x11af   :  { %5411 = vmatmul.mubr.msk.f32.vlgmr.msra.gmra.mxu1 %vm714_vm2, %v2909_v15 }
0x11b0   :  { %5419 = vmatpush3.xpose.msk.msra.mxu1 %vm714_vm2, %v3387_v30  ;;  %v3741_v32 = vpop.trf.xlu1  ;;  %5420 = vmatprep.mubr.msk.f32.mxu1 %vm5715_vm1, %v5714_v50 }
0x11b1   :  { %3852 = vxpose.xlu0.b32.start.end [1/1] (short) (narrow) %v3741_v32, 8  ;;  %5428 = vmatprep.subr.mxu1 %v5714_v50 }
0x11b2   :  { %v2910_v40 = vpop.trf.xlu0 }
0x11b3   :  { %5416 = vmatmul.mubr.msk.f32.vlgmr.msra.gmra.mxu0 %vm714_vm2, %v2910_v40 }
0x11b4   :  { %v3742_v60 = vpop.trf.xlu1  ;;  %5425 = vmatprep.mubr.msk.f32.mxu0 %vm5715_vm1, %v5714_v50 }
0x11b5   :  { %3884 = vxpose.xlu1.b32.start.end [1/1] (short) (narrow) %v3742_v60, 8 }
0x11b6   :  { %v2911_v41 = vpop.trf.xlu0 }
0x11b7   :  { %5421 = vmatmul.mubr.msk.f32.vlgmr.msra.gmra.mxu1 %vm714_vm2, %v2911_v41 }
0x11b8   :  { %v3743_v0 = vpop.trf.xlu1  ;;  %5430 = vmatprep.mubr.msk.f32.mxu1 %vm5715_vm1, %v5714_v50 }
0x11b9   :  { %3916 = vxpose.xlu1.b32.start.end [1/1] (short) (narrow) %v3743_v0, 8 }
0x11ba   :  { %v3772_v19 = vpop.trf.xlu0 }
0x11bb   :  { %5424 = vmatpush3.msra.mxu0 %v3772_v19 }
0x11bc   :  { %5433 = vmatprep.subr.mxu0 %v5714_v50 }
0x11be   :  { %v3773_v21 = vpop.trf.xlu0 }
0x11bf   :  { %5429 = vmatpush3.msra.mxu1 %v3773_v21 }
0x11c0   :  { %5438 = vmatprep.subr.mxu1 %v5714_v50 }
0x11c2   :  { %v3774_v63 = vpop.trf.xlu0 }
0x11c6   :  { %v3775_v3 = vpop.trf.xlu0 }
0x1229   :  { %v3836_v43 = vpop.trf.xlu1 }
0x122a   :  { %5426 = vmatmul.mubr.msk.f32.vlgmr.msra.gmra.mxu0 %vm714_vm2, %v3836_v43 }
0x122b   :  { %5434 = vmatpush3.msra.mxu0 %v3774_v63  ;;  %5435 = vmatprep.mubr.msk.f32.mxu0 %vm5715_vm1, %v5714_v50 }
0x122c   :  { %5443 = vmatprep.subr.mxu0 %v5714_v50 }
0x122d   :  { %v3868_v2 = vpop.trf.xlu0 }
0x122e   :  { %5431 = vmatmul.mubr.msk.f32.vlgmr.msra.gmra.mxu1 %vm714_vm2, %v3868_v2 }
0x122f   :  { %5439 = vmatpush3.msra.mxu1 %v3775_v3  ;;  %5440 = vmatprep.mubr.msk.f32.mxu1 %vm5715_vm1, %v5714_v50 }
0x1230   :  { %5448 = vmatprep.subr.mxu1 %v5714_v50 }
0x1231   :  { %v3900_v42 = vpop.trf.xlu1 }
0x1232   :  { %5436 = vmatmul.mubr.msk.f32.vlgmr.msra.gmra.mxu0 %vm714_vm2, %v3900_v42 }
0x1233   :  { %5445 = vmatprep.mubr.msk.f32.mxu0 %vm5715_vm1, %v5714_v50 }
0x1235   :  { %v3932_v47 = vpop.trf.xlu1 }
0x1236   :  { %5441 = vmatmul.mubr.msk.f32.vlgmr.msra.gmra.mxu1 %vm714_vm2, %v3932_v47 }
0x1237   :  { %5450 = vmatprep.mubr.msk.f32.mxu1 %vm5715_vm1, %v5714_v50 }
0x126b   :  { %v3460_v38 = vpop.f32.mrf.mxu0 }
0x126d   :  { %v5407_v8 = vpop.f32.mrf.mxu0 }
0x126f   :  { %v3536_v9 = vpop.f32.mrf.mxu1 }
0x1271   :  { %v5412_v11 = vpop.f32.mrf.mxu1 }
0x1273   :  { %v3612_v45 = vpop.f32.mrf.mxu0 }
0x1275   :  { %v5417_v24 = vpop.f32.mrf.mxu0 }
0x1277   :  { %v3688_v25 = vpop.f32.mrf.mxu1 }
0x1279   :  { %v5422_v27 = vpop.f32.mrf.mxu1 }
0x12ea   :  { %v4017_v29 = vpop.f32.mrf.mxu0 }
0x12eb   :  { %v4018_v33 = vadd.f32 %v4017_v29, %v6064_v58 }
0x12ec   :  { %v5427_v35 = vpop.f32.mrf.mxu0 }
0x12ed   :  { %v4240_v36 = vsel %vm714_vm2, %v4018_v33, -inf }
0x12ee   :  { %v4090_v61 = vpop.f32.mrf.mxu1  ;;  %4241 = vmax.xlane.f32.xlu1 %v4240_v36 }
0x12ef   :  { %v4091_v31 = vadd.f32 %v4090_v61, %v6064_v58 }
0x12f0   :  { %v5432_v37 = vpop.f32.mrf.mxu1 }
0x12f1   :  { %v4243_v22 = vsel %vm714_vm2, %v4091_v31, -inf }
0x12f2   :  { %4244 = vmax.xlane.f32.xlu0 %v4243_v22  ;;  %v4163_v49 = vpop.f32.mrf.mxu0 }
0x12f3   :  { %v4164_v39 = vadd.f32 %v4163_v49, %v6064_v58 }
0x12f4   :  { %v5437_v52 = vpop.f32.mrf.mxu0 }
0x12f5   :  { %v4246_v54 = vsel %vm714_vm2, %v4164_v39, -inf }
0x12f6   :  { %4247 = vmax.xlane.f32.xlu1 %v4246_v54  ;;  %v4236_v56 = vpop.f32.mrf.mxu1 }
0x12f7   :  { %v4237_v1 = vadd.f32 %v4236_v56, %v6064_v58 }
0x12f8   :  { %v5442_v57 = vpop.f32.mrf.mxu1 }
0x12f9   :  { %v4249_v15 = vsel %vm714_vm2, %v4237_v1, -inf }
0x12fa   :  { %4250 = vmax.xlane.f32.xlu1 %v4249_v15 }
0x1377   :  { %v4242_v30 = vpop.xlane.xlu1 %4241 }
0x1378   :  { %v4252_v32 = vsub.f32 %v4018_v33, %v4242_v30  ;;  %v5599_v33 = vld [vmem:[%s6481_s7] ss:$0 sm:$0xff] }
0x1379   :  { %v2825_v35 = vadd.f32 %v5599_v33, %v6314_v23 }
0x137a   :  { %v4256_v40 = vmul.f32 1.442695, %v4252_v32 }
0x137b   :  { %v4245_v60 = vpop.xlane.xlu0 %4244 }
0x137c   :  { %5573 = vpow2.f32 %v4256_v40  ;;  %v4253_v41 = vsub.f32 %v4091_v31, %v4245_v60 }
0x137e   :  { %v4258_v0 = vmul.f32 1.442695, %v4253_v41 }
0x137f   :  { %v4248_v19 = vpop.xlane.xlu1 %4247 }
0x1380   :  { %5575 = vpow2.f32 %v4258_v0  ;;  %v4254_v21 = vsub.f32 %v4164_v39, %v4248_v19 }
0x1382   :  { %v4260_v63 = vmul.f32 1.442695, %v4254_v21 }
0x1383   :  { %v4251_v3 = vpop.xlane.xlu1 %4250 }
0x1384   :  { %5577 = vpow2.f32 %v4260_v63  ;;  %v4255_v43 = vsub.f32 %v4237_v1, %v4251_v3 }
0x1386   :  { %v4262_v2 = vmul.f32 1.442695, %v4255_v43 }
0x1388   :  { %5579 = vpow2.f32 %v4262_v2 }
0x1389   :  { %v5574_v58 = vpop.eup %5573 }
0x138a   :  { %v4264_v42 = vsel %vm714_vm2, %v5574_v58, 0.0 }
0x138b   :  { %4265 = vadd.xlane.f32.xlu0 %v4264_v42 }
0x138d   :  { %v5576_v47 = vpop.eup %5575 }
0x138e   :  { %v4267_v8 = vsel %vm714_vm2, %v5576_v47, 0.0 }
0x138f   :  { %4268 = vadd.xlane.f32.xlu1 %v4267_v8 }
0x1391   :  { %v5578_v11 = vpop.eup %5577 }
0x1392   :  { %v4270_v24 = vsel %vm714_vm2, %v5578_v11, 0.0 }
0x1393   :  { %4271 = vadd.xlane.f32.xlu0 %v4270_v24 }
0x1395   :  { %v5580_v27 = vpop.eup %5579 }
0x1396   :  { %v4273_v29 = vsel %vm714_vm2, %v5580_v27, 0.0 }
0x1397   :  { %4274 = vadd.xlane.f32.xlu1 %v4273_v29 }
0x13c0   :  { %3788 = vxpose.xlu0.b32.start.end [1/1] (short) (narrow) %v2825_v35, 32 }
0x13ca   :  { %3692 = vxpose.xlu1.b32.start [1/4] (short) (narrow) %v3460_v38, 8 }
0x13ce   :  { %3693 = vxpose.xlu1.b32.cont [2/4] (short) (narrow) %v3536_v9, 8 }
0x13d2   :  { %3694 = vxpose.xlu1.b32.cont [3/4] (short) (narrow) %v3612_v45, 8 }
0x13d6   :  { %3695 = vxpose.xlu1.b32.end [4/4] (short) (narrow) %v3688_v25, 8 }
0x1414   :  { %v4266_v36 = vpop.xlane.xlu0 %4265 }
0x1415   :  { %5581 = vrcp.f32 %v4266_v36 }
0x1418   :  { %v4269_v61 = vpop.xlane.xlu1 %4268 }
0x1419   :  { %5583 = vrcp.f32 %v4269_v61 }
0x141c   :  { %v4272_v39 = vpop.xlane.xlu0 %4271 }
0x141d   :  { %5585 = vrcp.f32 %v4272_v39 }
0x1420   :  { %v4275_v23 = vpop.xlane.xlu1 %4274 }
0x1421   :  { %5587 = vrcp.f32 %v4275_v23 }
0x1422   :  { %v5582_v31 = vpop.eup %5581 }
0x1423   :  { %v4280_v37 = vmul.f32 %v5582_v31, %v5574_v58 }
0x1425   :  { %5444 = vmatpush3.xpose.msk.msra.mxu0 %vm714_vm2, %v4280_v37 }
0x1426   :  { %v5584_v22 = vpop.eup %5583  ;;  %5453 = vmatprep.subr.mxu0 %v5714_v50 }
0x1427   :  { %v4281_v49 = vmul.f32 %v5584_v22, %v5576_v47 }
0x1429   :  { %5449 = vmatpush3.xpose.msk.msra.mxu1 %vm714_vm2, %v4281_v49 }
0x142a   :  { %5458 = vmatprep.subr.mxu1 %v5714_v50  ;;  %v5586_v38 = vpop.eup %5585 }
0x142b   :  { %v4282_v45 = vmul.f32 %v5586_v38, %v5578_v11 }
0x142e   :  { %v5588_v25 = vpop.eup %5587 }
0x142f   :  { %v4283_v54 = vmul.f32 %v5588_v25, %v5580_v27 }
0x143c   :  { %v3804_v9 = vpop.trf.xlu0 }
0x143d   :  { %5446 = vmatmul.mubr.msk.f32.vlgmr.msra.gmra.mxu0 %vm714_vm2, %v3804_v9 }
0x143e   :  { %5454 = vmatpush3.xpose.msk.msra.mxu0 %vm714_vm2, %v4282_v45  ;;  %5455 = vmatprep.mubr.msk.f32.mxu0 %vm5715_vm1, %v5714_v50 }
0x143f   :  { %5463 = vmatprep.subr.mxu0 %v6094_v46 }
0x1440   :  { %v3805_v52 = vpop.trf.xlu0 }
0x1441   :  { %5451 = vmatmul.mubr.msk.f32.vlgmr.msra.gmra.mxu1 %vm714_vm2, %v3805_v52 }
0x1442   :  { %5459 = vmatpush3.xpose.msk.msra.mxu1 %vm714_vm2, %v4283_v54  ;;  %5460 = vmatprep.mubr.msk.f32.mxu1 %vm5715_vm1, %v5714_v50 }
0x1443   :  { %5474 = vmatprep.subr.mxu1 %v6133_v4 }
0x1444   :  { %v3806_v56 = vpop.trf.xlu0 }
0x1445   :  { %5456 = vmatmul.mubr.msk.f32.vlgmr.msra.gmra.mxu0 %vm714_vm2, %v3806_v56 }
0x1446   :  { %5464 = vmatpush3.msra.mxu0 %v6094_v46  ;;  %v3708_v50 = vpop.trf.xlu1 }
0x1447   :  { %5465 = vmatprep.subr.mxu0 %v6096_v10  ;;  %5471 = vmatprep.mubr.msk.f32.mxu0 %vm227_vm0, %v3708_v50 }
0x1448   :  { %v3807_v1 = vpop.trf.xlu0  ;;  %5466 = vmatpush3.msra.mxu0 %v6096_v10 }
0x1449   :  { %5461 = vmatmul.mubr.msk.f32.vlgmr.msra.gmra.mxu1 %vm714_vm2, %v3807_v1  ;;  %5467 = vmatprep.subr.mxu0 %v6101_v12 }
0x144a   :  { %5468 = vmatpush3.msra.mxu0 %v6101_v12  ;;  %5475 = vmatpush3.msra.mxu1 %v6133_v4 }
0x144b   :  { %5469 = vmatprep.subr.mxu0 %v6105_v13  ;;  %5476 = vmatprep.subr.mxu1 %v6137_v6 }
0x144c   :  { %5470 = vmatpush3.msra.mxu0 %v6105_v13  ;;  %5477 = vmatpush3.msra.mxu1 %v6137_v6 }
0x144d   :  { %5478 = vmatprep.subr.mxu1 %v6139_v5  ;;  %5485 = vmatprep.subr.mxu0 %v6152_v51 }
0x144e   :  { %5479 = vmatpush3.msra.mxu1 %v6139_v5 }
0x144f   :  { %5480 = vmatprep.subr.mxu1 %v6143_v48 }
0x1450   :  { %5481 = vmatpush3.msra.mxu1 %v6143_v48 }
0x14fd   :  { %v4356_v46 = vpop.f32.mrf.mxu0 }
0x14fe   :  { %4588 = vxpose.xlu0.b32.start [1/4] (short) (narrow) %v4356_v46, 8 }
0x14ff   :  { %v5447_v10 = vpop.f32.mrf.mxu0 }
0x1501   :  { %v4432_v12 = vpop.f32.mrf.mxu1 }
0x1502   :  { %4589 = vxpose.xlu0.b32.cont [2/4] (short) (narrow) %v4432_v12, 8 }
0x1503   :  { %v5452_v13 = vpop.f32.mrf.mxu1 }
0x1505   :  { %v4508_v4 = vpop.f32.mrf.mxu0 }
0x1506   :  { %4590 = vxpose.xlu0.b32.cont [3/4] (short) (narrow) %v4508_v4, 8 }
0x1507   :  { %v5457_v6 = vpop.f32.mrf.mxu0 }
0x1509   :  { %v4584_v57 = vpop.f32.mrf.mxu1 }
0x150a   :  { %4591 = vxpose.xlu0.b32.end [4/4] (short) (narrow) %v4584_v57, 8 }
0x150b   :  { %v5462_v15 = vpop.f32.mrf.mxu1 }
0x157a   :  { %v4604_v5 = vpop.trf.xlu0 }
0x157b   :  { %5472 = vmatmul.mubr.msk.f32.vlgmr.msra.gmra.mxu0 %vm227_vm0, %v4604_v5  ;;  %v5050_v5 = vld [vmem:[%s6492_s18] ss:$0 sm:$0xff] }
0x157c   :  { %5486 = vmatpush3.msra.mxu0 %v6152_v51 }
0x157d   :  { %5487 = vmatprep.subr.mxu0 %v6157_v53 }
0x157e   :  { %5488 = vmatpush3.msra.mxu0 %v6157_v53 }
0x157f   :  { %5489 = vmatprep.subr.mxu0 %v6165_v55 }
0x1580   :  { %5490 = vmatpush3.msra.mxu0 %v6165_v55 }
0x1581   :  { %5491 = vmatprep.subr.mxu0 %v6172_v7 }
0x1582   :  { %5492 = vmatpush3.msra.mxu0 %v6172_v7 }
0x1583   :  { %5493 = vmatprep.subr.mxu0 %v6205_v44 }
0x1584   :  { %5494 = vmatpush3.msra.mxu0 %v6205_v44 }
0x1585   :  { %5495 = vmatprep.subr.mxu0 %v6212_v14 }
0x1586   :  { %5496 = vmatpush3.msra.mxu0 %v6212_v14 }
0x1587   :  { %5497 = vmatprep.subr.mxu0 %v6219_v16 }
0x1588   :  { %5498 = vmatpush3.msra.mxu0 %v6219_v16 }
0x1589   :  { %5499 = vmatprep.subr.mxu0 %v6225_v18 }
0x158a   :  { %5500 = vmatpush3.msra.mxu0 %v6225_v18 }
0x163b   :  { %v5473_v48 = vpop.f32.mrf.mxu0 }
0x163c   :  { %v4702_v51 = vadd.f32 %v5473_v48, %v6255_v17 }
0x163d   :  { %v4692_v53 = vpop.f32.mrf.mxu0 }
0x163e   :  { %v4704_v55 = vadd.f32 %v6115_v34, %v4702_v51  ;;  %v4701_v7 = vadd.f32 %v4692_v53, %v6259_v62  ;;  %v5051_v53 = vld [vmem:[%s6493_s19] ss:$0 sm:$0xff] }
0x1640   :  { %v4703_v44 = vadd.f32 %v6115_v34, %v4701_v7  ;;  %v4708_v14 = vsel %vm227_vm0, %v4704_v55, 0.0 }
0x1641   :  { %4709 = vadd.xlane.f32.xlu0 %v4708_v14 }
0x1642   :  { %v4705_v30 = vsel %vm227_vm0, %v4703_v44, 0.0 }
0x1643   :  { %4706 = vadd.xlane.f32.xlu1 %v4705_v30 }
0x16ca   :  { %v4710_v16 = vpop.xlane.xlu0 %4709 }
0x16cb   :  { %v4712_v32 = vmul.f32 0.03125, %v4710_v16 }
0x16cc   :  { %v4707_v40 = vpop.xlane.xlu1 %4706 }
0x16cd   :  { %v4711_v18 = vmul.f32 0.03125, %v4707_v40  ;;  %v4714_v60 = vsub.f32 %v4704_v55, %v4712_v32 }
0x16cf   :  { %v4713_v41 = vsub.f32 %v4703_v44, %v4711_v18  ;;  %v4716_v19 = vmul.f32 %v4714_v60, %v4714_v60 }
0x16d1   :  { %v4715_v17 = vmul.f32 %v4713_v41, %v4713_v41  ;;  %v4720_v62 = vsel %vm227_vm0, %v4716_v19, 0.0 }
0x16d3   :  { %v4717_v0 = vsel %vm227_vm0, %v4715_v17, 0.0 }
0x16d4   :  { %4718 = vadd.xlane.f32.xlu1 %v4717_v0 }
0x16d8   :  { %4721 = vadd.xlane.f32.xlu1 %v4720_v62 }
0x175d   :  { %v4719_v34 = vpop.xlane.xlu1 %4718 }
0x175e   :  { %v4723_v21 = vmul.f32 0.03125, %v4719_v34 }
0x1760   :  { %v4725_v63 = vadd.f32 1e-05, %v4723_v21 }
0x1761   :  { %v4722_v3 = vpop.xlane.xlu1 %4721 }
0x1762   :  { %5589 = vrsqrt.f32 %v4725_v63  ;;  %v4724_v43 = vmul.f32 0.03125, %v4722_v3 }
0x1764   :  { %v4726_v2 = vadd.f32 1e-05, %v4724_v43 }
0x1766   :  { %5591 = vrsqrt.f32 %v4726_v2 }
0x176f   :  { %v5590_v58 = vpop.eup %5589 }
0x1770   :  { %v4729_v42 = vmul.f32 %v5590_v58, %v4713_v41 }
0x1772   :  { %v4731_v47 = vmul.f32 %v6181_v26, %v4729_v42 }
0x1773   :  { %v5592_v8 = vpop.eup %5591 }
0x1774   :  { %v4730_v11 = vmul.f32 %v5592_v8, %v4714_v60  ;;  %v4733_v24 = vadd.f32 %v6186_v28, %v4731_v47 }
0x1776   :  { %5482 = vmatprep.mubr.msk.f32.mxu1 %vm227_vm0, %v4733_v24  ;;  %v4732_v27 = vmul.f32 %v6181_v26, %v4730_v11 }
0x1778   :  { %v4734_v29 = vadd.f32 %v6186_v28, %v4732_v27 }
0x177a   :  { %5483 = vmatmul.mubr.msk.f32.vlgmr.msra.gmra.mxu1 %vm227_vm0, %v4734_v29 }
0x183a   :  { %v5484_v33 = vpop.f32.mrf.mxu1 }
0x183b   :  { %v4813_v35 = vadd.f32 %v5484_v33, %v6234_v20 }
0x183c   :  { %v4807_v36 = vpop.f32.mrf.mxu1 }
0x183d   :  { %v4808_v61 = vadd.f32 %v6234_v20, %v4807_v36  ;;  %v4817_v37 = vmax.f32 %v4813_v35, 0.0 }
0x183f   :  { %v4816_v31 = vmax.f32 %v4808_v61, 0.0 }
0x1841   :  { %5501 = vmatprep.mubr.msk.f32.mxu0 %vm2481_vm5, %v4816_v31 }
0x1842   :  { %5502 = vmatmul.mubr.msk.f32.vlgmr.msra.gmra.mxu0 %vm2481_vm5, %v4817_v37 }
0x1902   :  { %v5503_v22 = vpop.f32.mrf.mxu0 }
0x1903   :  { %v4900_v49 = vadd.f32 %v5503_v22, %v4704_v55 }
0x1904   :  { %v4890_v39 = vpop.f32.mrf.mxu0 }
0x1905   :  { %v4902_v26 = vadd.f32 %v6251_v59, %v4900_v49  ;;  %v4899_v28 = vadd.f32 %v4890_v39, %v4703_v44 }
0x1907   :  { %v4901_v23 = vadd.f32 %v6251_v59, %v4899_v28  ;;  %v4908_v38 = vsel %vm227_vm0, %v4902_v26, 0.0 }
0x1908   :  { %4909 = vadd.xlane.f32.xlu0 %v4908_v38 }
0x1909   :  { %v4905_v9 = vsel %vm227_vm0, %v4901_v23, 0.0 }
0x190a   :  { %4906 = vadd.xlane.f32.xlu1 %v4905_v9 }
0x1991   :  { %v4910_v20 = vpop.xlane.xlu0 %4909 }
0x1992   :  { %v4912_v45 = vmul.f32 0.03125, %v4910_v20 }
0x1993   :  { %v4907_v25 = vpop.xlane.xlu1 %4906 }
0x1994   :  { %v4914_v52 = vsub.f32 %v4902_v26, %v4912_v45  ;;  %v4911_v54 = vmul.f32 0.03125, %v4907_v25 }
0x1996   :  { %v4913_v56 = vsub.f32 %v4901_v23, %v4911_v54  ;;  %v4916_v1 = vmul.f32 %v4914_v52, %v4914_v52 }
0x1998   :  { %v4920_v50 = vsel %vm227_vm0, %v4916_v1, 0.0  ;;  %v4915_v46 = vmul.f32 %v4913_v56, %v4913_v56 }
0x1999   :  { %4921 = vadd.xlane.f32.xlu0 %v4920_v50 }
0x199a   :  { %v4917_v10 = vsel %vm227_vm0, %v4915_v46, 0.0 }
0x199b   :  { %4918 = vadd.xlane.f32.xlu1 %v4917_v10 }
0x1a22   :  { %v4922_v59 = vpop.xlane.xlu0 %4921 }
0x1a23   :  { %v4924_v12 = vmul.f32 0.03125, %v4922_v59 }
0x1a24   :  { %v4919_v13 = vpop.xlane.xlu1 %4918 }
0x1a25   :  { %v4926_v4 = vadd.f32 1e-05, %v4924_v12  ;;  %v4923_v6 = vmul.f32 0.03125, %v4919_v13 }
0x1a27   :  { %5593 = vrsqrt.f32 %v4926_v4  ;;  %v4925_v57 = vadd.f32 1e-05, %v4923_v6 }
0x1a29   :  { %5595 = vrsqrt.f32 %v4925_v57 }
0x1a34   :  { %v5594_v15 = vpop.eup %5593 }
0x1a35   :  { %v4930_v48 = vmul.f32 %v5594_v15, %v4914_v52 }
0x1a36   :  { %v5596_v51 = vpop.eup %5595 }
0x1a37   :  { %v4929_v55 = vmul.f32 %v5596_v51, %v4913_v56  ;;  %v4938_v7 = vmul.f32 %v5050_v5, %v4930_v48 }
0x1a39   :  { %v4937_v44 = vmul.f32 %v5050_v5, %v4929_v55  ;;  %v4946_v14 = vadd.f32 %v5051_v53, %v4938_v7 }
0x1a3b   :  { %v4945_v30 = vadd.f32 %v5051_v53, %v4937_v44  ;;  %4948 = vst.msk [vmem:[#allocation10 + $0x8] sm:$0xff] %vm227_vm0, %v4946_v14 }
0x1a3d   :  { %4947 = vst.msk [vmem:[#allocation10] sm:$0xff] %vm227_vm0, %v4945_v30 }
0x1a3e   :  { %5691 = shalt.err (!%p5688_p10)
}
0x1a3f   :  { %4960 = dma.vmem_to_hbm [thread:$0]  %s4955_s27, 256, %s6494_s20, [#allocation4], %s5710_s25, %s5710_s25, %s5711_s3  }
0x1a40   :  { %5706 = dma.done.wait [#allocation4], 256  }
0x1a41   :  { %5707 = vsyncadd [#allocation4], 4294967040 }
0x1a42   :  { %4964 = vsyncpa [#allocation3], 1 }
0x1a43   :  { %4965 = vsyncpa [#allocation6], 1 }
0x1a44   :  { %4966 = vsyncpa [#allocation9], 1 }
0x1a45   :  { %4967 = vsyncpa [#allocation4], 1 }

</bundles_post_ra>
